<compile_context>
chip_gen: v7x
topology: tpu7x:2x2x1
jax: 0.10.0
libtpu: 0.0.40
codegen_flags: <defaults>
</compile_context>

<pallas_src>
import jax
import jax.numpy as jnp
from jax.experimental import pallas as pl
from jax.experimental.pallas import tpu as pltpu

EPS = 1e-5
_LEFT_HALO = 8        # interior starts at a sublane-aligned offset on the W axis


def _round_up(x, m):
    return (x + m - 1) // m * m


def _vmem_capacity_bytes():
    """Generation-aware physical VMEM size (falls back to the v7x 64 MiB floor)."""
    try:
        cap = getattr(pltpu.get_tpu_info(), "vmem_capacity_bytes", None)
        if cap:
            return int(cap)
    except Exception:
        pass
    return 64 << 20


def _resblock_kernel(x_ref, w1_ref, g1_ref, be1_ref, w2_ref, g2_ref, be2_ref,
                     o_ref, pad_ref, slab_ref, acc_ref):
    """Whole ResBlock forward on one (B, H, W, Cp) tile resident in VMEM.

    Cp (= x_ref.shape[-1]) is already padded to a multiple of 128 lanes.
      pad_ref : (B, H+2, Wp, Cp) f32  zero-haloed activations (both convs)
      slab_ref: (B*H*W, 3*Cp)   bf16 per-kernel-row im2col slab
      acc_ref : (B*H*W, Cp)     f32  conv output accumulator / BN input
    """
    B, H, W, C = x_ref.shape
    BHW = B * H * W
    Hp, Wp = pad_ref.shape[1], pad_ref.shape[2]
    LO = _LEFT_HALO

    # Zero ONLY the halo of the padded scratch (the interior is fully
    # overwritten before every use; the zero halo is shared by both convs).
    pad_ref[:, 0:1, :, :] = jnp.zeros((B, 1, Wp, C), jnp.float32)
    pad_ref[:, 1 + H:, :, :] = jnp.zeros((B, Hp - 1 - H, Wp, C), jnp.float32)
    pad_ref[:, 1:1 + H, LO - 1:LO, :] = jnp.zeros((B, H, 1, C), jnp.float32)
    pad_ref[:, 1:1 + H, LO + W:LO + W + 1, :] = jnp.zeros((B, H, 1, C),
                                                          jnp.float32)

    def conv3x3(act4, w_ref):
        """3x3 'same' conv: per-kernel-row im2col + 3 accumulated MXU matmuls.

        Conv bias is intentionally omitted: the BatchNorm that always follows
        subtracts the per-channel batch mean, cancelling any constant bias.
        Slab and weights are bf16 (full MXU throughput); accumulation is f32.
        """
        # Sublane-aligned interior store (W offset = 8).
        pad_ref[:, 1:1 + H, LO:LO + W, :] = act4
        for dy in range(3):
            # Gather the 3 horizontal taps of kernel row dy into a lane-dense
            # (BHW, 3*C) bf16 slab (column offsets dx*C are multiples of 128).
            for dx in range(3):
                tap = pad_ref[:, dy:dy + H, LO - 1 + dx:LO - 1 + dx + W, :]
                slab_ref[:, dx * C:(dx + 1) * C] = (
                    tap.reshape(BHW, C).astype(jnp.bfloat16))
            part = jnp.dot(slab_ref[...], w_ref[dy],
                           preferred_element_type=jnp.float32)
            if dy == 0:
                acc_ref[...] = part
            else:
                acc_ref[...] += part

    def batchnorm(g_ref, be_ref):
        """Training-mode BN (batch stats over N*H*W, biased var, eps=1e-5)
        applied to the conv output in acc_ref.  Two-pass centered variance."""
        y = acc_ref[...]
        inv_n = jnp.float32(1.0 / BHW)
        mean = jnp.sum(y, axis=0, keepdims=True) * inv_n          # (1, C)
        d = y - mean
        var = jnp.sum(d * d, axis=0, keepdims=True) * inv_n       # biased
        return d * (g_ref[...] * jax.lax.rsqrt(var + EPS)) + be_ref[...]

    x4 = x_ref[...]                                   # (B, H, W, C) f32

    conv3x3(x4, w1_ref)
    h = jnp.maximum(batchnorm(g1_ref, be1_ref), 0.0)  # (BHW, C) f32

    conv3x3(h.reshape(B, H, W, C), w2_ref)
    h = batchnorm(g2_ref, be2_ref)

    # Residual add + final ReLU; last dim is a multiple of 128 -> dense stores.
    o_ref[...] = jnp.maximum(h + x4.reshape(BHW, C), 0.0).reshape(B, H, W, C)


@jax.jit
def resblock_forward(x_nchw, params):
    """x_nchw: (B, C, H, W) float32  ->  (B, C, H, W) float32."""
    w1, b1, g1, be1, w2, b2, g2, be2 = params
    del b1, b2  # cancelled exactly by the following BatchNorm mean subtraction

    x = jnp.transpose(x_nchw, (0, 2, 3, 1)).astype(jnp.float32)   # NHWC
    B, H, W, C = x.shape

    # Pad channels to a full 128-lane register.  Padded channels carry exact
    # zeros end-to-end (zero weights, gamma=1, beta=0) and are sliced off.
    Cp = _round_up(C, 128)
    pc = Cp - C
    xp = jnp.pad(x, ((0, 0), (0, 0), (0, 0), (0, pc)))

    def pad_w(w):   # HWIO (3,3,C,C) -> zero-pad -> per-row fused (3, 3*Cp, Cp) bf16
        wp = jnp.pad(w, ((0, 0), (0, 0), (0, pc), (0, pc)))
        return wp.reshape(3, 3 * Cp, Cp).astype(jnp.bfloat16)

    w1p, w2p = pad_w(w1), pad_w(w2)
    g1p = jnp.pad(g1, (0, pc), constant_values=1.0).reshape(1, Cp)
    g2p = jnp.pad(g2, (0, pc), constant_values=1.0).reshape(1, Cp)
    be1p = jnp.pad(be1, (0, pc)).reshape(1, Cp)
    be2p = jnp.pad(be2, (0, pc)).reshape(1, Cp)

    Hp = H + 2
    Wp = _round_up(_LEFT_HALO + W + 1, 8)     # aligned interior + right halo
    BHW = B * H * W

    # Honest VMEM budget (bytes): inputs + output + scratch + live temporaries.
    bytes_needed = (
        4 * xp.size                              # f32 input activations
        + 2 * (w1p.size + w2p.size)              # bf16 fused weights
        + 4 * 4 * Cp                             # gamma/beta x2
        + 4 * BHW * Cp                           # f32 output
        + 4 * B * Hp * Wp * Cp                   # f32 padded activation scratch
        + 2 * BHW * 3 * Cp                       # bf16 im2col slab
        + 4 * BHW * Cp                           # f32 conv-output accumulator
        + 3 * 4 * BHW * Cp)                      # live f32 temps (h, centered, out)
    cap = _vmem_capacity_bytes() - (8 << 20)     # leave headroom
    vmem_limit = int(min(cap, max(int(1.25 * bytes_needed), 32 << 20)))

    flops = 2 * (2 * BHW * (9 * Cp) * Cp) + 24 * BHW * Cp   # 2 convs + BN/ReLU
    bytes_accessed = 4 * xp.size + 2 * (w1p.size + w2p.size) + 4 * BHW * Cp

    vmem_spec = pl.BlockSpec(memory_space=pltpu.MemorySpace.VMEM)
    out = pl.pallas_call(
        _resblock_kernel,
        out_shape=jax.ShapeDtypeStruct((B, H, W, Cp), jnp.float32),
        in_specs=[vmem_spec] * 7,
        out_specs=vmem_spec,
        scratch_shapes=[
            pltpu.VMEM((B, Hp, Wp, Cp), jnp.float32),   # zero-haloed activations
            pltpu.VMEM((BHW, 3 * Cp), jnp.bfloat16),    # per-dy im2col slab
            pltpu.VMEM((BHW, Cp), jnp.float32),         # conv-output accumulator
        ],
        compiler_params=pltpu.CompilerParams(vmem_limit_bytes=vmem_limit),
        cost_estimate=pl.CostEstimate(flops=flops,
                                      transcendentals=2 * Cp,
                                      bytes_accessed=bytes_accessed),
    )(xp, w1p, g1p, be1p, w2p, g2p, be2p)

    out = out[..., :C]                                    # drop padded channels
    return jnp.transpose(out, (0, 3, 1, 2))               # back to NCHW


def resblock_reference(x_nchw, params):
    """Pure-JAX reference (PyTorch semantics, incl. conv bias & two-pass BN)."""
    w1, b1, g1, be1, w2, b2, g2, be2 = params
    x = jnp.transpose(x_nchw, (0, 2, 3, 1)).astype(jnp.float32)

    def conv(y, w, b):
        out = jax.lax.conv_general_dilated(
            y, w, window_strides=(1, 1), padding="SAME",
            dimension_numbers=("NHWC", "HWIO", "NHWC"))
        return out + b.reshape(1, 1, 1, -1)

    def bn(y, g, be):
        mean = y.mean(axis=(0, 1, 2), keepdims=True)
        var = jnp.square(y - mean).mean(axis=(0, 1, 2), keepdims=True)
        return (y - mean) / jnp.sqrt(var + EPS) * g.reshape(1, 1, 1, -1) \
            + be.reshape(1, 1, 1, -1)

    h = jax.nn.relu(bn(conv(x, w1, b1), g1, be1))
    h = bn(conv(h, w2, b2), g2, be2)
    out = jax.nn.relu(h + x)
    return jnp.transpose(out, (0, 3, 1, 2))


def init_params(key, num_hidden):
    """Deterministic synthetic parameters (shapes match nn.Conv2d/BatchNorm2d)."""
    k1, k2, k3, k4, k5, k6 = jax.random.split(key, 6)
    fan_in = num_hidden * 9
    scale = 1.0 / jnp.sqrt(fan_in)
    # conv weights in HWIO (kh, kw, Cin, Cout); conv bias (C,)
    w1 = jax.random.uniform(k1, (3, 3, num_hidden, num_hidden), jnp.float32,
                            -scale, scale)
    b1 = jax.random.uniform(k2, (num_hidden,), jnp.float32, -scale, scale)
    w2 = jax.random.uniform(k3, (3, 3, num_hidden, num_hidden), jnp.float32,
                            -scale, scale)
    b2 = jax.random.uniform(k4, (num_hidden,), jnp.float32, -scale, scale)
    # BN affine params (gamma, beta)
    g1 = 1.0 + 0.1 * jax.random.normal(k5, (num_hidden,), jnp.float32)
    be1 = 0.1 * jax.random.normal(k6, (num_hidden,), jnp.float32)
    g2 = jnp.ones((num_hidden,), jnp.float32)
    be2 = jnp.zeros((num_hidden,), jnp.float32)
    return (w1, b1, g1, be1, w2, b2, g2, be2)


if __name__ == "__main__":
    num_hidden = 32
    B, H, W = 2, 8, 8

    key = jax.random.PRNGKey(0)
    kx, kp = jax.random.split(key)
    x = jax.random.normal(kx, (B, num_hidden, H, W), jnp.float32)   # NCHW
    params = init_params(kp, num_hidden)

    out = jax.block_until_ready(resblock_forward(x, params))

    ref = resblock_reference(x, params)
    err = float(jnp.max(jnp.abs(out - ref)))
    # bf16 MXU operands (f32 accumulation) -> relaxed tolerance vs f32 reference.
    if err > 3e-2:
        raise AssertionError(f"Pallas ResBlock mismatch vs reference: max|diff|={err}")

    print("KERNEL_OK")
</pallas_src>

<mosaic_0001>
module attributes {stable_mosaic.version = 11 : i64} {
  func.func @_resblock_kernel(%arg0: memref<2x8x8x128xf32, #tpu.memory_space<vmem>>, %arg1: memref<3x384x128xbf16, #tpu.memory_space<vmem>>, %arg2: memref<1x128xf32, #tpu.memory_space<vmem>>, %arg3: memref<1x128xf32, #tpu.memory_space<vmem>>, %arg4: memref<3x384x128xbf16, #tpu.memory_space<vmem>>, %arg5: memref<1x128xf32, #tpu.memory_space<vmem>>, %arg6: memref<1x128xf32, #tpu.memory_space<vmem>>, %arg7: memref<2x8x8x128xf32, #tpu.memory_space<vmem>>, %arg8: memref<2x10x24x128xf32, #tpu.memory_space<vmem>>, %arg9: memref<128x384xbf16, #tpu.memory_space<vmem>>, %arg10: memref<128x128xf32, #tpu.memory_space<vmem>>) attributes {dimension_semantics = [], scalar_prefetch = 0 : i64, scratch_operands = 3 : i64, tpu.core_type = #tpu.core_type<tc>} {
    %cst = arith.constant 0.000000e+00 : f32
    %0 = vector.broadcast %cst : f32 to vector<2x1x24x128xf32>
    %c0 = arith.constant 0 : index
    %c0_0 = arith.constant 0 : index
    %c0_1 = arith.constant 0 : index
    %c0_2 = arith.constant 0 : index
    %1 = vector.load %arg8[%c0, %c0_0, %c0_1, %c0_2] : memref<2x10x24x128xf32, #tpu.memory_space<vmem>>, vector<2x1x24x128xf32>
    tpu.vector_store %arg8[%c0, %c0_0, %c0_1, %c0_2], %0 {strides = array<i32>} : memref<2x10x24x128xf32, #tpu.memory_space<vmem>>, vector<2x1x24x128xf32>,
    %cst_3 = arith.constant 0.000000e+00 : f32
    %2 = vector.broadcast %cst_3 : f32 to vector<2x1x24x128xf32>
    %c0_4 = arith.constant 0 : index
    %c9 = arith.constant 9 : index
    %c0_5 = arith.constant 0 : index
    %c0_6 = arith.constant 0 : index
    %3 = vector.load %arg8[%c0_4, %c9, %c0_5, %c0_6] : memref<2x10x24x128xf32, #tpu.memory_space<vmem>>, vector<2x1x24x128xf32>
    tpu.vector_store %arg8[%c0_4, %c9, %c0_5, %c0_6], %2 {strides = array<i32>} : memref<2x10x24x128xf32, #tpu.memory_space<vmem>>, vector<2x1x24x128xf32>,
    %cst_7 = arith.constant 0.000000e+00 : f32
    %4 = vector.broadcast %cst_7 : f32 to vector<2x8x1x128xf32>
    %c0_8 = arith.constant 0 : index
    %c1 = arith.constant 1 : index
    %c7 = arith.constant 7 : index
    %c0_9 = arith.constant 0 : index
    %5 = vector.load %arg8[%c0_8, %c1, %c7, %c0_9] : memref<2x10x24x128xf32, #tpu.memory_space<vmem>>, vector<2x8x1x128xf32>
    tpu.vector_store %arg8[%c0_8, %c1, %c7, %c0_9], %4 {strides = array<i32>} : memref<2x10x24x128xf32, #tpu.memory_space<vmem>>, vector<2x8x1x128xf32>,
    %cst_10 = arith.constant 0.000000e+00 : f32
    %6 = vector.broadcast %cst_10 : f32 to vector<2x8x1x128xf32>
    %c0_11 = arith.constant 0 : index
    %c1_12 = arith.constant 1 : index
    %c16 = arith.constant 16 : index
    %c0_13 = arith.constant 0 : index
    %7 = vector.load %arg8[%c0_11, %c1_12, %c16, %c0_13] : memref<2x10x24x128xf32, #tpu.memory_space<vmem>>, vector<2x8x1x128xf32>
    tpu.vector_store %arg8[%c0_11, %c1_12, %c16, %c0_13], %6 {strides = array<i32>} : memref<2x10x24x128xf32, #tpu.memory_space<vmem>>, vector<2x8x1x128xf32>,
    %c0_14 = arith.constant 0 : index
    %c0_15 = arith.constant 0 : index
    %c0_16 = arith.constant 0 : index
    %c0_17 = arith.constant 0 : index
    %8 = vector.load %arg0[%c0_14, %c0_15, %c0_16, %c0_17] : memref<2x8x8x128xf32, #tpu.memory_space<vmem>>, vector<2x8x8x128xf32>
    %c0_18 = arith.constant 0 : index
    %c1_19 = arith.constant 1 : index
    %c8 = arith.constant 8 : index
    %c0_20 = arith.constant 0 : index
    %9 = vector.load %arg8[%c0_18, %c1_19, %c8, %c0_20] : memref<2x10x24x128xf32, #tpu.memory_space<vmem>>, vector<2x8x8x128xf32>
    tpu.vector_store %arg8[%c0_18, %c1_19, %c8, %c0_20], %8 {strides = array<i32>} : memref<2x10x24x128xf32, #tpu.memory_space<vmem>>, vector<2x8x8x128xf32>,
    %c0_21 = arith.constant 0 : index
    %c0_22 = arith.constant 0 : index
    %c7_23 = arith.constant 7 : index
    %c0_24 = arith.constant 0 : index
    %10 = vector.load %arg8[%c0_21, %c0_22, %c7_23, %c0_24] : memref<2x10x24x128xf32, #tpu.memory_space<vmem>>, vector<2x8x8x128xf32>
    %11 = vector.shape_cast %10 : vector<2x8x8x128xf32> to vector<128x128xf32>
    %12 = arith.truncf %11 : vector<128x128xf32> to vector<128x128xbf16>
    %c0_25 = arith.constant 0 : index
    %c0_26 = arith.constant 0 : index
    %13 = vector.load %arg9[%c0_25, %c0_26] : memref<128x384xbf16, #tpu.memory_space<vmem>>, vector<128x128xbf16>
    tpu.vector_store %arg9[%c0_25, %c0_26], %12 {strides = array<i32>} : memref<128x384xbf16, #tpu.memory_space<vmem>>, vector<128x128xbf16>,
    %c0_27 = arith.constant 0 : index
    %c0_28 = arith.constant 0 : index
    %c8_29 = arith.constant 8 : index
    %c0_30 = arith.constant 0 : index
    %14 = vector.load %arg8[%c0_27, %c0_28, %c8_29, %c0_30] : memref<2x10x24x128xf32, #tpu.memory_space<vmem>>, vector<2x8x8x128xf32>
    %15 = vector.shape_cast %14 : vector<2x8x8x128xf32> to vector<128x128xf32>
    %16 = arith.truncf %15 : vector<128x128xf32> to vector<128x128xbf16>
    %c0_31 = arith.constant 0 : index
    %c128 = arith.constant 128 : index
    %17 = vector.load %arg9[%c0_31, %c128] : memref<128x384xbf16, #tpu.memory_space<vmem>>, vector<128x128xbf16>
    tpu.vector_store %arg9[%c0_31, %c128], %16 {strides = array<i32>} : memref<128x384xbf16, #tpu.memory_space<vmem>>, vector<128x128xbf16>,
    %c0_32 = arith.constant 0 : index
    %c0_33 = arith.constant 0 : index
    %c9_34 = arith.constant 9 : index
    %c0_35 = arith.constant 0 : index
    %18 = vector.load %arg8[%c0_32, %c0_33, %c9_34, %c0_35] : memref<2x10x24x128xf32, #tpu.memory_space<vmem>>, vector<2x8x8x128xf32>
    %19 = vector.shape_cast %18 : vector<2x8x8x128xf32> to vector<128x128xf32>
    %20 = arith.truncf %19 : vector<128x128xf32> to vector<128x128xbf16>
    %c0_36 = arith.constant 0 : index
    %c256 = arith.constant 256 : index
    %21 = vector.load %arg9[%c0_36, %c256] : memref<128x384xbf16, #tpu.memory_space<vmem>>, vector<128x128xbf16>
    tpu.vector_store %arg9[%c0_36, %c256], %20 {strides = array<i32>} : memref<128x384xbf16, #tpu.memory_space<vmem>>, vector<128x128xbf16>,
    %c0_37 = arith.constant 0 : index
    %c0_38 = arith.constant 0 : index
    %22 = vector.load %arg9[%c0_37, %c0_38] : memref<128x384xbf16, #tpu.memory_space<vmem>>, vector<128x384xbf16>
    %c0_39 = arith.constant 0 : index
    %c0_40 = arith.constant 0 : index
    %c0_41 = arith.constant 0 : index
    %23 = vector.load %arg1[%c0_39, %c0_40, %c0_41] : memref<3x384x128xbf16, #tpu.memory_space<vmem>>, vector<1x384x128xbf16>
    %24 = vector.shape_cast %23 : vector<1x384x128xbf16> to vector<384x128xbf16>
    %cst_42 = arith.constant dense<0.000000e+00> : vector<128x128xf32>
    %25 = tpu.matmul %22, %24, %cst_42 {dimension_numbers = #tpu.dot_dimension_numbers<[1], [0], [0], [1], [0, 0, 1, 1], [], []>} : vector<128x384xbf16>, vector<384x128xbf16>, vector<128x128xf32> -> vector<128x128xf32>
    %c0_43 = arith.constant 0 : index
    %c0_44 = arith.constant 0 : index
    %26 = vector.load %arg10[%c0_43, %c0_44] : memref<128x128xf32, #tpu.memory_space<vmem>>, vector<128x128xf32>
    tpu.vector_store %arg10[%c0_43, %c0_44], %25 {strides = array<i32>} : memref<128x128xf32, #tpu.memory_space<vmem>>, vector<128x128xf32>,
    %c0_45 = arith.constant 0 : index
    %c1_46 = arith.constant 1 : index
    %c7_47 = arith.constant 7 : index
    %c0_48 = arith.constant 0 : index
    %27 = vector.load %arg8[%c0_45, %c1_46, %c7_47, %c0_48] : memref<2x10x24x128xf32, #tpu.memory_space<vmem>>, vector<2x8x8x128xf32>
    %28 = vector.shape_cast %27 : vector<2x8x8x128xf32> to vector<128x128xf32>
    %29 = arith.truncf %28 : vector<128x128xf32> to vector<128x128xbf16>
    %c0_49 = arith.constant 0 : index
    %c0_50 = arith.constant 0 : index
    %30 = vector.load %arg9[%c0_49, %c0_50] : memref<128x384xbf16, #tpu.memory_space<vmem>>, vector<128x128xbf16>
    tpu.vector_store %arg9[%c0_49, %c0_50], %29 {strides = array<i32>} : memref<128x384xbf16, #tpu.memory_space<vmem>>, vector<128x128xbf16>,
    %c0_51 = arith.constant 0 : index
    %c1_52 = arith.constant 1 : index
    %c8_53 = arith.constant 8 : index
    %c0_54 = arith.constant 0 : index
    %31 = vector.load %arg8[%c0_51, %c1_52, %c8_53, %c0_54] : memref<2x10x24x128xf32, #tpu.memory_space<vmem>>, vector<2x8x8x128xf32>
    %32 = vector.shape_cast %31 : vector<2x8x8x128xf32> to vector<128x128xf32>
    %33 = arith.truncf %32 : vector<128x128xf32> to vector<128x128xbf16>
    %c0_55 = arith.constant 0 : index
    %c128_56 = arith.constant 128 : index
    %34 = vector.load %arg9[%c0_55, %c128_56] : memref<128x384xbf16, #tpu.memory_space<vmem>>, vector<128x128xbf16>
    tpu.vector_store %arg9[%c0_55, %c128_56], %33 {strides = array<i32>} : memref<128x384xbf16, #tpu.memory_space<vmem>>, vector<128x128xbf16>,
    %c0_57 = arith.constant 0 : index
    %c1_58 = arith.constant 1 : index
    %c9_59 = arith.constant 9 : index
    %c0_60 = arith.constant 0 : index
    %35 = vector.load %arg8[%c0_57, %c1_58, %c9_59, %c0_60] : memref<2x10x24x128xf32, #tpu.memory_space<vmem>>, vector<2x8x8x128xf32>
    %36 = vector.shape_cast %35 : vector<2x8x8x128xf32> to vector<128x128xf32>
    %37 = arith.truncf %36 : vector<128x128xf32> to vector<128x128xbf16>
    %c0_61 = arith.constant 0 : index
    %c256_62 = arith.constant 256 : index
    %38 = vector.load %arg9[%c0_61, %c256_62] : memref<128x384xbf16, #tpu.memory_space<vmem>>, vector<128x128xbf16>
    tpu.vector_store %arg9[%c0_61, %c256_62], %37 {strides = array<i32>} : memref<128x384xbf16, #tpu.memory_space<vmem>>, vector<128x128xbf16>,
    %c0_63 = arith.constant 0 : index
    %c0_64 = arith.constant 0 : index
    %39 = vector.load %arg9[%c0_63, %c0_64] : memref<128x384xbf16, #tpu.memory_space<vmem>>, vector<128x384xbf16>
    %c1_65 = arith.constant 1 : index
    %c0_66 = arith.constant 0 : index
    %c0_67 = arith.constant 0 : index
    %40 = vector.load %arg1[%c1_65, %c0_66, %c0_67] : memref<3x384x128xbf16, #tpu.memory_space<vmem>>, vector<1x384x128xbf16>
    %41 = vector.shape_cast %40 : vector<1x384x128xbf16> to vector<384x128xbf16>
    %cst_68 = arith.constant dense<0.000000e+00> : vector<128x128xf32>
    %42 = tpu.matmul %39, %41, %cst_68 {dimension_numbers = #tpu.dot_dimension_numbers<[1], [0], [0], [1], [0, 0, 1, 1], [], []>} : vector<128x384xbf16>, vector<384x128xbf16>, vector<128x128xf32> -> vector<128x128xf32>
    %c0_69 = arith.constant 0 : index
    %c0_70 = arith.constant 0 : index
    %43 = vector.load %arg10[%c0_69, %c0_70] : memref<128x128xf32, #tpu.memory_space<vmem>>, vector<128x128xf32>
    %44 = arith.addf %43, %42 : vector<128x128xf32>
    %c0_71 = arith.constant 0 : index
    %c0_72 = arith.constant 0 : index
    %45 = vector.load %arg10[%c0_71, %c0_72] : memref<128x128xf32, #tpu.memory_space<vmem>>, vector<128x128xf32>
    tpu.vector_store %arg10[%c0_71, %c0_72], %44 {strides = array<i32>} : memref<128x128xf32, #tpu.memory_space<vmem>>, vector<128x128xf32>,
    %c0_73 = arith.constant 0 : index
    %c2 = arith.constant 2 : index
    %c7_74 = arith.constant 7 : index
    %c0_75 = arith.constant 0 : index
    %46 = vector.load %arg8[%c0_73, %c2, %c7_74, %c0_75] : memref<2x10x24x128xf32, #tpu.memory_space<vmem>>, vector<2x8x8x128xf32>
    %47 = vector.shape_cast %46 : vector<2x8x8x128xf32> to vector<128x128xf32>
    %48 = arith.truncf %47 : vector<128x128xf32> to vector<128x128xbf16>
    %c0_76 = arith.constant 0 : index
    %c0_77 = arith.constant 0 : index
    %49 = vector.load %arg9[%c0_76, %c0_77] : memref<128x384xbf16, #tpu.memory_space<vmem>>, vector<128x128xbf16>
    tpu.vector_store %arg9[%c0_76, %c0_77], %48 {strides = array<i32>} : memref<128x384xbf16, #tpu.memory_space<vmem>>, vector<128x128xbf16>,
    %c0_78 = arith.constant 0 : index
    %c2_79 = arith.constant 2 : index
    %c8_80 = arith.constant 8 : index
    %c0_81 = arith.constant 0 : index
    %50 = vector.load %arg8[%c0_78, %c2_79, %c8_80, %c0_81] : memref<2x10x24x128xf32, #tpu.memory_space<vmem>>, vector<2x8x8x128xf32>
    %51 = vector.shape_cast %50 : vector<2x8x8x128xf32> to vector<128x128xf32>
    %52 = arith.truncf %51 : vector<128x128xf32> to vector<128x128xbf16>
    %c0_82 = arith.constant 0 : index
    %c128_83 = arith.constant 128 : index
    %53 = vector.load %arg9[%c0_82, %c128_83] : memref<128x384xbf16, #tpu.memory_space<vmem>>, vector<128x128xbf16>
    tpu.vector_store %arg9[%c0_82, %c128_83], %52 {strides = array<i32>} : memref<128x384xbf16, #tpu.memory_space<vmem>>, vector<128x128xbf16>,
    %c0_84 = arith.constant 0 : index
    %c2_85 = arith.constant 2 : index
    %c9_86 = arith.constant 9 : index
    %c0_87 = arith.constant 0 : index
    %54 = vector.load %arg8[%c0_84, %c2_85, %c9_86, %c0_87] : memref<2x10x24x128xf32, #tpu.memory_space<vmem>>, vector<2x8x8x128xf32>
    %55 = vector.shape_cast %54 : vector<2x8x8x128xf32> to vector<128x128xf32>
    %56 = arith.truncf %55 : vector<128x128xf32> to vector<128x128xbf16>
    %c0_88 = arith.constant 0 : index
    %c256_89 = arith.constant 256 : index
    %57 = vector.load %arg9[%c0_88, %c256_89] : memref<128x384xbf16, #tpu.memory_space<vmem>>, vector<128x128xbf16>
    tpu.vector_store %arg9[%c0_88, %c256_89], %56 {strides = array<i32>} : memref<128x384xbf16, #tpu.memory_space<vmem>>, vector<128x128xbf16>,
    %c0_90 = arith.constant 0 : index
    %c0_91 = arith.constant 0 : index
    %58 = vector.load %arg9[%c0_90, %c0_91] : memref<128x384xbf16, #tpu.memory_space<vmem>>, vector<128x384xbf16>
    %c2_92 = arith.constant 2 : index
    %c0_93 = arith.constant 0 : index
    %c0_94 = arith.constant 0 : index
    %59 = vector.load %arg1[%c2_92, %c0_93, %c0_94] : memref<3x384x128xbf16, #tpu.memory_space<vmem>>, vector<1x384x128xbf16>
    %60 = vector.shape_cast %59 : vector<1x384x128xbf16> to vector<384x128xbf16>
    %cst_95 = arith.constant dense<0.000000e+00> : vector<128x128xf32>
    %61 = tpu.matmul %58, %60, %cst_95 {dimension_numbers = #tpu.dot_dimension_numbers<[1], [0], [0], [1], [0, 0, 1, 1], [], []>} : vector<128x384xbf16>, vector<384x128xbf16>, vector<128x128xf32> -> vector<128x128xf32>
    %c0_96 = arith.constant 0 : index
    %c0_97 = arith.constant 0 : index
    %62 = vector.load %arg10[%c0_96, %c0_97] : memref<128x128xf32, #tpu.memory_space<vmem>>, vector<128x128xf32>
    %63 = arith.addf %62, %61 : vector<128x128xf32>
    %c0_98 = arith.constant 0 : index
    %c0_99 = arith.constant 0 : index
    %64 = vector.load %arg10[%c0_98, %c0_99] : memref<128x128xf32, #tpu.memory_space<vmem>>, vector<128x128xf32>
    tpu.vector_store %arg10[%c0_98, %c0_99], %63 {strides = array<i32>} : memref<128x128xf32, #tpu.memory_space<vmem>>, vector<128x128xf32>,
    %c0_100 = arith.constant 0 : index
    %c0_101 = arith.constant 0 : index
    %65 = vector.load %arg10[%c0_100, %c0_101] : memref<128x128xf32, #tpu.memory_space<vmem>>, vector<128x128xf32>
    %cst_102 = arith.constant dense<0.000000e+00> : vector<128xf32>
    %66 = vector.multi_reduction <add>, %65, %cst_102 [0] : vector<128x128xf32> to vector<128xf32>
    %67 = vector.shape_cast %66 : vector<128xf32> to vector<1x128xf32>
    %cst_103 = arith.constant 7.812500e-03 : f32
    %68 = vector.broadcast %cst_103 : f32 to vector<1x128xf32>
    %69 = arith.mulf %67, %68 : vector<1x128xf32>
    %70 = vector.broadcast %69 : vector<1x128xf32> to vector<128x128xf32>
    %71 = arith.subf %65, %70 : vector<128x128xf32>
    %72 = arith.mulf %71, %71 : vector<128x128xf32>
    %cst_104 = arith.constant dense<0.000000e+00> : vector<128xf32>
    %73 = vector.multi_reduction <add>, %72, %cst_104 [0] : vector<128x128xf32> to vector<128xf32>
    %74 = vector.shape_cast %73 : vector<128xf32> to vector<1x128xf32>
    %cst_105 = arith.constant 7.812500e-03 : f32
    %75 = vector.broadcast %cst_105 : f32 to vector<1x128xf32>
    %76 = arith.mulf %74, %75 : vector<1x128xf32>
    %c0_106 = arith.constant 0 : index
    %c0_107 = arith.constant 0 : index
    %77 = vector.load %arg2[%c0_106, %c0_107] : memref<1x128xf32, #tpu.memory_space<vmem>>, vector<1x128xf32>
    %cst_108 = arith.constant 9.99999974E-6 : f32
    %78 = vector.broadcast %cst_108 : f32 to vector<1x128xf32>
    %79 = arith.addf %76, %78 : vector<1x128xf32>
    %80 = math.rsqrt %79 : vector<1x128xf32>
    %81 = arith.mulf %77, %80 : vector<1x128xf32>
    %82 = vector.broadcast %81 : vector<1x128xf32> to vector<128x128xf32>
    %83 = arith.mulf %71, %82 : vector<128x128xf32>
    %c0_109 = arith.constant 0 : index
    %c0_110 = arith.constant 0 : index
    %84 = vector.load %arg3[%c0_109, %c0_110] : memref<1x128xf32, #tpu.memory_space<vmem>>, vector<1x128xf32>
    %85 = vector.broadcast %84 : vector<1x128xf32> to vector<128x128xf32>
    %86 = arith.addf %83, %85 : vector<128x128xf32>
    %cst_111 = arith.constant 0.000000e+00 : f32
    %87 = vector.broadcast %cst_111 : f32 to vector<128x128xf32>
    %88 = arith.maximumf %86, %87 : vector<128x128xf32>
    %89 = vector.shape_cast %88 : vector<128x128xf32> to vector<2x8x8x128xf32>
    %c0_112 = arith.constant 0 : index
    %c1_113 = arith.constant 1 : index
    %c8_114 = arith.constant 8 : index
    %c0_115 = arith.constant 0 : index
    %90 = vector.load %arg8[%c0_112, %c1_113, %c8_114, %c0_115] : memref<2x10x24x128xf32, #tpu.memory_space<vmem>>, vector<2x8x8x128xf32>
    tpu.vector_store %arg8[%c0_112, %c1_113, %c8_114, %c0_115], %89 {strides = array<i32>} : memref<2x10x24x128xf32, #tpu.memory_space<vmem>>, vector<2x8x8x128xf32>,
    %c0_116 = arith.constant 0 : index
    %c0_117 = arith.constant 0 : index
    %c7_118 = arith.constant 7 : index
    %c0_119 = arith.constant 0 : index
    %91 = vector.load %arg8[%c0_116, %c0_117, %c7_118, %c0_119] : memref<2x10x24x128xf32, #tpu.memory_space<vmem>>, vector<2x8x8x128xf32>
    %92 = vector.shape_cast %91 : vector<2x8x8x128xf32> to vector<128x128xf32>
    %93 = arith.truncf %92 : vector<128x128xf32> to vector<128x128xbf16>
    %c0_120 = arith.constant 0 : index
    %c0_121 = arith.constant 0 : index
    %94 = vector.load %arg9[%c0_120, %c0_121] : memref<128x384xbf16, #tpu.memory_space<vmem>>, vector<128x128xbf16>
    tpu.vector_store %arg9[%c0_120, %c0_121], %93 {strides = array<i32>} : memref<128x384xbf16, #tpu.memory_space<vmem>>, vector<128x128xbf16>,
    %c0_122 = arith.constant 0 : index
    %c0_123 = arith.constant 0 : index
    %c8_124 = arith.constant 8 : index
    %c0_125 = arith.constant 0 : index
    %95 = vector.load %arg8[%c0_122, %c0_123, %c8_124, %c0_125] : memref<2x10x24x128xf32, #tpu.memory_space<vmem>>, vector<2x8x8x128xf32>
    %96 = vector.shape_cast %95 : vector<2x8x8x128xf32> to vector<128x128xf32>
    %97 = arith.truncf %96 : vector<128x128xf32> to vector<128x128xbf16>
    %c0_126 = arith.constant 0 : index
    %c128_127 = arith.constant 128 : index
    %98 = vector.load %arg9[%c0_126, %c128_127] : memref<128x384xbf16, #tpu.memory_space<vmem>>, vector<128x128xbf16>
    tpu.vector_store %arg9[%c0_126, %c128_127], %97 {strides = array<i32>} : memref<128x384xbf16, #tpu.memory_space<vmem>>, vector<128x128xbf16>,
    %c0_128 = arith.constant 0 : index
    %c0_129 = arith.constant 0 : index
    %c9_130 = arith.constant 9 : index
    %c0_131 = arith.constant 0 : index
    %99 = vector.load %arg8[%c0_128, %c0_129, %c9_130, %c0_131] : memref<2x10x24x128xf32, #tpu.memory_space<vmem>>, vector<2x8x8x128xf32>
    %100 = vector.shape_cast %99 : vector<2x8x8x128xf32> to vector<128x128xf32>
    %101 = arith.truncf %100 : vector<128x128xf32> to vector<128x128xbf16>
    %c0_132 = arith.constant 0 : index
    %c256_133 = arith.constant 256 : index
    %102 = vector.load %arg9[%c0_132, %c256_133] : memref<128x384xbf16, #tpu.memory_space<vmem>>, vector<128x128xbf16>
    tpu.vector_store %arg9[%c0_132, %c256_133], %101 {strides = array<i32>} : memref<128x384xbf16, #tpu.memory_space<vmem>>, vector<128x128xbf16>,
    %c0_134 = arith.constant 0 : index
    %c0_135 = arith.constant 0 : index
    %103 = vector.load %arg9[%c0_134, %c0_135] : memref<128x384xbf16, #tpu.memory_space<vmem>>, vector<128x384xbf16>
    %c0_136 = arith.constant 0 : index
    %c0_137 = arith.constant 0 : index
    %c0_138 = arith.constant 0 : index
    %104 = vector.load %arg4[%c0_136, %c0_137, %c0_138] : memref<3x384x128xbf16, #tpu.memory_space<vmem>>, vector<1x384x128xbf16>
    %105 = vector.shape_cast %104 : vector<1x384x128xbf16> to vector<384x128xbf16>
    %cst_139 = arith.constant dense<0.000000e+00> : vector<128x128xf32>
    %106 = tpu.matmul %103, %105, %cst_139 {dimension_numbers = #tpu.dot_dimension_numbers<[1], [0], [0], [1], [0, 0, 1, 1], [], []>} : vector<128x384xbf16>, vector<384x128xbf16>, vector<128x128xf32> -> vector<128x128xf32>
    %c0_140 = arith.constant 0 : index
    %c0_141 = arith.constant 0 : index
    %107 = vector.load %arg10[%c0_140, %c0_141] : memref<128x128xf32, #tpu.memory_space<vmem>>, vector<128x128xf32>
    tpu.vector_store %arg10[%c0_140, %c0_141], %106 {strides = array<i32>} : memref<128x128xf32, #tpu.memory_space<vmem>>, vector<128x128xf32>,
    %c0_142 = arith.constant 0 : index
    %c1_143 = arith.constant 1 : index
    %c7_144 = arith.constant 7 : index
    %c0_145 = arith.constant 0 : index
    %108 = vector.load %arg8[%c0_142, %c1_143, %c7_144, %c0_145] : memref<2x10x24x128xf32, #tpu.memory_space<vmem>>, vector<2x8x8x128xf32>
    %109 = vector.shape_cast %108 : vector<2x8x8x128xf32> to vector<128x128xf32>
    %110 = arith.truncf %109 : vector<128x128xf32> to vector<128x128xbf16>
    %c0_146 = arith.constant 0 : index
    %c0_147 = arith.constant 0 : index
    %111 = vector.load %arg9[%c0_146, %c0_147] : memref<128x384xbf16, #tpu.memory_space<vmem>>, vector<128x128xbf16>
    tpu.vector_store %arg9[%c0_146, %c0_147], %110 {strides = array<i32>} : memref<128x384xbf16, #tpu.memory_space<vmem>>, vector<128x128xbf16>,
    %c0_148 = arith.constant 0 : index
    %c1_149 = arith.constant 1 : index
    %c8_150 = arith.constant 8 : index
    %c0_151 = arith.constant 0 : index
    %112 = vector.load %arg8[%c0_148, %c1_149, %c8_150, %c0_151] : memref<2x10x24x128xf32, #tpu.memory_space<vmem>>, vector<2x8x8x128xf32>
    %113 = vector.shape_cast %112 : vector<2x8x8x128xf32> to vector<128x128xf32>
    %114 = arith.truncf %113 : vector<128x128xf32> to vector<128x128xbf16>
    %c0_152 = arith.constant 0 : index
    %c128_153 = arith.constant 128 : index
    %115 = vector.load %arg9[%c0_152, %c128_153] : memref<128x384xbf16, #tpu.memory_space<vmem>>, vector<128x128xbf16>
    tpu.vector_store %arg9[%c0_152, %c128_153], %114 {strides = array<i32>} : memref<128x384xbf16, #tpu.memory_space<vmem>>, vector<128x128xbf16>,
    %c0_154 = arith.constant 0 : index
    %c1_155 = arith.constant 1 : index
    %c9_156 = arith.constant 9 : index
    %c0_157 = arith.constant 0 : index
    %116 = vector.load %arg8[%c0_154, %c1_155, %c9_156, %c0_157] : memref<2x10x24x128xf32, #tpu.memory_space<vmem>>, vector<2x8x8x128xf32>
    %117 = vector.shape_cast %116 : vector<2x8x8x128xf32> to vector<128x128xf32>
    %118 = arith.truncf %117 : vector<128x128xf32> to vector<128x128xbf16>
    %c0_158 = arith.constant 0 : index
    %c256_159 = arith.constant 256 : index
    %119 = vector.load %arg9[%c0_158, %c256_159] : memref<128x384xbf16, #tpu.memory_space<vmem>>, vector<128x128xbf16>
    tpu.vector_store %arg9[%c0_158, %c256_159], %118 {strides = array<i32>} : memref<128x384xbf16, #tpu.memory_space<vmem>>, vector<128x128xbf16>,
    %c0_160 = arith.constant 0 : index
    %c0_161 = arith.constant 0 : index
    %120 = vector.load %arg9[%c0_160, %c0_161] : memref<128x384xbf16, #tpu.memory_space<vmem>>, vector<128x384xbf16>
    %c1_162 = arith.constant 1 : index
    %c0_163 = arith.constant 0 : index
    %c0_164 = arith.constant 0 : index
    %121 = vector.load %arg4[%c1_162, %c0_163, %c0_164] : memref<3x384x128xbf16, #tpu.memory_space<vmem>>, vector<1x384x128xbf16>
    %122 = vector.shape_cast %121 : vector<1x384x128xbf16> to vector<384x128xbf16>
    %cst_165 = arith.constant dense<0.000000e+00> : vector<128x128xf32>
    %123 = tpu.matmul %120, %122, %cst_165 {dimension_numbers = #tpu.dot_dimension_numbers<[1], [0], [0], [1], [0, 0, 1, 1], [], []>} : vector<128x384xbf16>, vector<384x128xbf16>, vector<128x128xf32> -> vector<128x128xf32>
    %c0_166 = arith.constant 0 : index
    %c0_167 = arith.constant 0 : index
    %124 = vector.load %arg10[%c0_166, %c0_167] : memref<128x128xf32, #tpu.memory_space<vmem>>, vector<128x128xf32>
    %125 = arith.addf %124, %123 : vector<128x128xf32>
    %c0_168 = arith.constant 0 : index
    %c0_169 = arith.constant 0 : index
    %126 = vector.load %arg10[%c0_168, %c0_169] : memref<128x128xf32, #tpu.memory_space<vmem>>, vector<128x128xf32>
    tpu.vector_store %arg10[%c0_168, %c0_169], %125 {strides = array<i32>} : memref<128x128xf32, #tpu.memory_space<vmem>>, vector<128x128xf32>,
    %c0_170 = arith.constant 0 : index
    %c2_171 = arith.constant 2 : index
    %c7_172 = arith.constant 7 : index
    %c0_173 = arith.constant 0 : index
    %127 = vector.load %arg8[%c0_170, %c2_171, %c7_172, %c0_173] : memref<2x10x24x128xf32, #tpu.memory_space<vmem>>, vector<2x8x8x128xf32>
    %128 = vector.shape_cast %127 : vector<2x8x8x128xf32> to vector<128x128xf32>
    %129 = arith.truncf %128 : vector<128x128xf32> to vector<128x128xbf16>
    %c0_174 = arith.constant 0 : index
    %c0_175 = arith.constant 0 : index
    %130 = vector.load %arg9[%c0_174, %c0_175] : memref<128x384xbf16, #tpu.memory_space<vmem>>, vector<128x128xbf16>
    tpu.vector_store %arg9[%c0_174, %c0_175], %129 {strides = array<i32>} : memref<128x384xbf16, #tpu.memory_space<vmem>>, vector<128x128xbf16>,
    %c0_176 = arith.constant 0 : index
    %c2_177 = arith.constant 2 : index
    %c8_178 = arith.constant 8 : index
    %c0_179 = arith.constant 0 : index
    %131 = vector.load %arg8[%c0_176, %c2_177, %c8_178, %c0_179] : memref<2x10x24x128xf32, #tpu.memory_space<vmem>>, vector<2x8x8x128xf32>
    %132 = vector.shape_cast %131 : vector<2x8x8x128xf32> to vector<128x128xf32>
    %133 = arith.truncf %132 : vector<128x128xf32> to vector<128x128xbf16>
    %c0_180 = arith.constant 0 : index
    %c128_181 = arith.constant 128 : index
    %134 = vector.load %arg9[%c0_180, %c128_181] : memref<128x384xbf16, #tpu.memory_space<vmem>>, vector<128x128xbf16>
    tpu.vector_store %arg9[%c0_180, %c128_181], %133 {strides = array<i32>} : memref<128x384xbf16, #tpu.memory_space<vmem>>, vector<128x128xbf16>,
    %c0_182 = arith.constant 0 : index
    %c2_183 = arith.constant 2 : index
    %c9_184 = arith.constant 9 : index
    %c0_185 = arith.constant 0 : index
    %135 = vector.load %arg8[%c0_182, %c2_183, %c9_184, %c0_185] : memref<2x10x24x128xf32, #tpu.memory_space<vmem>>, vector<2x8x8x128xf32>
    %136 = vector.shape_cast %135 : vector<2x8x8x128xf32> to vector<128x128xf32>
    %137 = arith.truncf %136 : vector<128x128xf32> to vector<128x128xbf16>
    %c0_186 = arith.constant 0 : index
    %c256_187 = arith.constant 256 : index
    %138 = vector.load %arg9[%c0_186, %c256_187] : memref<128x384xbf16, #tpu.memory_space<vmem>>, vector<128x128xbf16>
    tpu.vector_store %arg9[%c0_186, %c256_187], %137 {strides = array<i32>} : memref<128x384xbf16, #tpu.memory_space<vmem>>, vector<128x128xbf16>,
    %c0_188 = arith.constant 0 : index
    %c0_189 = arith.constant 0 : index
    %139 = vector.load %arg9[%c0_188, %c0_189] : memref<128x384xbf16, #tpu.memory_space<vmem>>, vector<128x384xbf16>
    %c2_190 = arith.constant 2 : index
    %c0_191 = arith.constant 0 : index
    %c0_192 = arith.constant 0 : index
    %140 = vector.load %arg4[%c2_190, %c0_191, %c0_192] : memref<3x384x128xbf16, #tpu.memory_space<vmem>>, vector<1x384x128xbf16>
    %141 = vector.shape_cast %140 : vector<1x384x128xbf16> to vector<384x128xbf16>
    %cst_193 = arith.constant dense<0.000000e+00> : vector<128x128xf32>
    %142 = tpu.matmul %139, %141, %cst_193 {dimension_numbers = #tpu.dot_dimension_numbers<[1], [0], [0], [1], [0, 0, 1, 1], [], []>} : vector<128x384xbf16>, vector<384x128xbf16>, vector<128x128xf32> -> vector<128x128xf32>
    %c0_194 = arith.constant 0 : index
    %c0_195 = arith.constant 0 : index
    %143 = vector.load %arg10[%c0_194, %c0_195] : memref<128x128xf32, #tpu.memory_space<vmem>>, vector<128x128xf32>
    %144 = arith.addf %143, %142 : vector<128x128xf32>
    %c0_196 = arith.constant 0 : index
    %c0_197 = arith.constant 0 : index
    %145 = vector.load %arg10[%c0_196, %c0_197] : memref<128x128xf32, #tpu.memory_space<vmem>>, vector<128x128xf32>
    tpu.vector_store %arg10[%c0_196, %c0_197], %144 {strides = array<i32>} : memref<128x128xf32, #tpu.memory_space<vmem>>, vector<128x128xf32>,
    %c0_198 = arith.constant 0 : index
    %c0_199 = arith.constant 0 : index
    %146 = vector.load %arg10[%c0_198, %c0_199] : memref<128x128xf32, #tpu.memory_space<vmem>>, vector<128x128xf32>
    %cst_200 = arith.constant dense<0.000000e+00> : vector<128xf32>
    %147 = vector.multi_reduction <add>, %146, %cst_200 [0] : vector<128x128xf32> to vector<128xf32>
    %148 = vector.shape_cast %147 : vector<128xf32> to vector<1x128xf32>
    %cst_201 = arith.constant 7.812500e-03 : f32
    %149 = vector.broadcast %cst_201 : f32 to vector<1x128xf32>
    %150 = arith.mulf %148, %149 : vector<1x128xf32>
    %151 = vector.broadcast %150 : vector<1x128xf32> to vector<128x128xf32>
    %152 = arith.subf %146, %151 : vector<128x128xf32>
    %153 = arith.mulf %152, %152 : vector<128x128xf32>
    %cst_202 = arith.constant dense<0.000000e+00> : vector<128xf32>
    %154 = vector.multi_reduction <add>, %153, %cst_202 [0] : vector<128x128xf32> to vector<128xf32>
    %155 = vector.shape_cast %154 : vector<128xf32> to vector<1x128xf32>
    %cst_203 = arith.constant 7.812500e-03 : f32
    %156 = vector.broadcast %cst_203 : f32 to vector<1x128xf32>
    %157 = arith.mulf %155, %156 : vector<1x128xf32>
    %c0_204 = arith.constant 0 : index
    %c0_205 = arith.constant 0 : index
    %158 = vector.load %arg5[%c0_204, %c0_205] : memref<1x128xf32, #tpu.memory_space<vmem>>, vector<1x128xf32>
    %cst_206 = arith.constant 9.99999974E-6 : f32
    %159 = vector.broadcast %cst_206 : f32 to vector<1x128xf32>
    %160 = arith.addf %157, %159 : vector<1x128xf32>
    %161 = math.rsqrt %160 : vector<1x128xf32>
    %162 = arith.mulf %158, %161 : vector<1x128xf32>
    %163 = vector.broadcast %162 : vector<1x128xf32> to vector<128x128xf32>
    %164 = arith.mulf %152, %163 : vector<128x128xf32>
    %c0_207 = arith.constant 0 : index
    %c0_208 = arith.constant 0 : index
    %165 = vector.load %arg6[%c0_207, %c0_208] : memref<1x128xf32, #tpu.memory_space<vmem>>, vector<1x128xf32>
    %166 = vector.broadcast %165 : vector<1x128xf32> to vector<128x128xf32>
    %167 = arith.addf %164, %166 : vector<128x128xf32>
    %168 = vector.shape_cast %8 : vector<2x8x8x128xf32> to vector<128x128xf32>
    %169 = arith.addf %167, %168 : vector<128x128xf32>
    %cst_209 = arith.constant 0.000000e+00 : f32
    %170 = vector.broadcast %cst_209 : f32 to vector<128x128xf32>
    %171 = arith.maximumf %169, %170 : vector<128x128xf32>
    %172 = vector.shape_cast %171 : vector<128x128xf32> to vector<2x8x8x128xf32>
    %c0_210 = arith.constant 0 : index
    %c0_211 = arith.constant 0 : index
    %c0_212 = arith.constant 0 : index
    %c0_213 = arith.constant 0 : index
    %173 = vector.load %arg7[%c0_210, %c0_211, %c0_212, %c0_213] : memref<2x8x8x128xf32, #tpu.memory_space<vmem>>, vector<2x8x8x128xf32>
    tpu.vector_store %arg7[%c0_210, %c0_211, %c0_212, %c0_213], %172 {strides = array<i32>} : memref<2x8x8x128xf32, #tpu.memory_space<vmem>>, vector<2x8x8x128xf32>,
    return
  }
}

</mosaic_0001>

<bundles_post_ra>
// kernel: resblock_forward.1
= control target key start
LH: loop header
LB: loop body
LE: loop exit
PB: predicated region body
PF: predicated region fallthrough
CT: control target
= control target key end

     0   :  { %v5057_v1 = vmov 0.0   ;;  %s6501_s1 = inlined_call_operand.vmem [shape: bf16[3,384,128], index: 1, kind: input, shape index: {}]   ;;  %s6502_s0 = inlined_call_operand.vmem [shape: f32[2,8,8,128], index: 0, kind: input, shape index: {}]   ;;  %s6503_s4 = inlined_call_operand.vmem [shape: bf16[3,384,128], index: 4, kind: input, shape index: {}]   ;;  %s6504_s2 = inlined_call_operand.vmem [shape: f32[1,128], index: 2, kind: input, shape index: {}]   ;;  %s6505_s3 = inlined_call_operand.vmem [shape: f32[1,128], index: 3, kind: input, shape index: {}]   ;;  %s6506_s5 = inlined_call_operand.vmem [shape: f32[1,128], index: 5, kind: input, shape index: {}]   ;;  %s6507_s6 = inlined_call_operand.vmem [shape: f32[1,128], index: 6, kind: input, shape index: {}]   ;;  %s6508_s7 = inlined_call_operand.vmem [shape: f32[2,8,8,128], index: 7, kind: output, shape index: {}]  }
   0x1   :  { %v4907_v0 = vld [vmem:[%s6501_s1 + $0x40] sm:$0xff]   ;;  %28 = vst [vmem:[#allocation2 + $0x8] sm:$0xff] %v5057_v1  ;;  %27 = vst [vmem:[#allocation2] sm:$0xff] %v5057_v1  ;;  %v4911_v5 = vld [vmem:[%s6501_s1 + $0x48] sm:$0xff]  }
   0x2   :  { %29 = vst [vmem:[#allocation2 + $0x10] sm:$0xff] %v5057_v1  ;;  %30 = vst [vmem:[#allocation2 + $0xf0] sm:$0xff] %v5057_v1  ;;  %v4908_v2 = vld [vmem:[%s6501_s1 + $0x100] sm:$0xff]   ;;  %4074 = vmatprep.subr.bf16.mxu0 %v4907_v0  ;;  %v4912_v6 = vld [vmem:[%s6501_s1 + $0x108] sm:$0xff]  }
   0x3   :  { %31 = vst [vmem:[#allocation2 + $0xf8] sm:$0xff] %v5057_v1  ;;  %32 = vst [vmem:[#allocation2 + $0x100] sm:$0xff] %v5057_v1  ;;  %v4909_v3 = vld [vmem:[%s6501_s1] sm:$0xff]   ;;  %4154 = vmatprep.subr.bf16.mxu1 %v4908_v2  ;;  %v4913_v7 = vld [vmem:[%s6501_s1 + $0x8] sm:$0xff]  }
   0x4   :  { %34 = vst [vmem:[#allocation2 + $0xd8] sm:$0xff] %v5057_v1  ;;  %35 = vst [vmem:[#allocation2 + $0xe0] sm:$0xff] %v5057_v1  ;;  %v4910_v4 = vld [vmem:[%s6501_s1 + $0xc0] sm:$0xff]   ;;  %4075 = vmatpush3.bf16.msra.mxu0 %v4909_v3  ;;  %v4914_v8 = vld [vmem:[%s6501_s1 + $0xc8] sm:$0xff]  }
   0x5   :  { %36 = vst [vmem:[#allocation2 + $0xe8] sm:$0xff] %v5057_v1  ;;  %37 = vst [vmem:[#allocation2 + $0x1c8] sm:$0xff] %v5057_v1  ;;  %4155 = vmatpush3.bf16.msra.mxu1 %v4910_v4  ;;  %4076 = vmatprep.subr.bf16.mxu0 %v4911_v5  ;;  %v4915_v9 = vld [vmem:[%s6501_s1 + $0x50] sm:$0xff]   ;;  %v4919_v13 = vld [vmem:[%s6501_s1 + $0x58] sm:$0xff]  }
   0x6   :  { %38 = vst [vmem:[#allocation2 + $0x1d0] sm:$0xff] %v5057_v1  ;;  %39 = vst [vmem:[#allocation2 + $0x1d8] sm:$0xff] %v5057_v1  ;;  %4156 = vmatprep.subr.bf16.mxu1 %v4912_v6  ;;  %v4916_v10 = vld [vmem:[%s6501_s1 + $0x110] sm:$0xff]   ;;  %v4920_v14 = vld [vmem:[%s6501_s1 + $0x118] sm:$0xff]  }
   0x7   :  { %41 = vst [vmem:[#allocation2 + $0x1f] sm:$0x1] %v5057_v1  ;;  %42 = vst [vmem:[#allocation2 + $0x37] sm:$0x1] %v5057_v1  ;;  %v4917_v11 = vld [vmem:[%s6501_s1 + $0x10] sm:$0xff]   ;;  %v4921_v15 = vld [vmem:[%s6501_s1 + $0x18] sm:$0xff]  }
   0x8   :  { %43 = vst [vmem:[#allocation2 + $0x4f] sm:$0x1] %v5057_v1  ;;  %44 = vst [vmem:[#allocation2 + $0x67] sm:$0x1] %v5057_v1  ;;  %4077 = vmatpush3.bf16.msra.mxu0 %v4913_v7  ;;  %v4918_v12 = vld [vmem:[%s6501_s1 + $0xd0] sm:$0xff]   ;;  %v4922_v16 = vld [vmem:[%s6501_s1 + $0xd8] sm:$0xff]  }
   0x9   :  { %45 = vst [vmem:[#allocation2 + $0x7f] sm:$0x1] %v5057_v1  ;;  %46 = vst [vmem:[#allocation2 + $0x97] sm:$0x1] %v5057_v1  ;;  %4157 = vmatpush3.bf16.msra.mxu1 %v4914_v8  ;;  %4078 = vmatprep.subr.bf16.mxu0 %v4915_v9  ;;  %v4923_v17 = vld [vmem:[%s6501_s1 + $0x60] sm:$0xff]   ;;  %v4927_v21 = vld [vmem:[%s6501_s1 + $0x68] sm:$0xff]  }
   0xa   :  { %47 = vst [vmem:[#allocation2 + $0xaf] sm:$0x1] %v5057_v1  ;;  %48 = vst [vmem:[#allocation2 + $0xc7] sm:$0x1] %v5057_v1  ;;  %4158 = vmatprep.subr.bf16.mxu1 %v4916_v10  ;;  %v4924_v18 = vld [vmem:[%s6501_s1 + $0x120] sm:$0xff]   ;;  %v4928_v22 = vld [vmem:[%s6501_s1 + $0x128] sm:$0xff]  }
   0xb   :  { %49 = vst [vmem:[#allocation2 + $0x10f] sm:$0x1] %v5057_v1  ;;  %50 = vst [vmem:[#allocation2 + $0x127] sm:$0x1] %v5057_v1  ;;  %v4925_v19 = vld [vmem:[%s6501_s1 + $0x20] sm:$0xff]   ;;  %v4929_v23 = vld [vmem:[%s6501_s1 + $0x28] sm:$0xff]  }
   0xc   :  { %51 = vst [vmem:[#allocation2 + $0x13f] sm:$0x1] %v5057_v1  ;;  %52 = vst [vmem:[#allocation2 + $0x157] sm:$0x1] %v5057_v1  ;;  %4079 = vmatpush3.bf16.msra.mxu0 %v4917_v11  ;;  %v4926_v20 = vld [vmem:[%s6501_s1 + $0xe0] sm:$0xff]   ;;  %v4930_v24 = vld [vmem:[%s6501_s1 + $0xe8] sm:$0xff]  }
   0xd   :  { %53 = vst [vmem:[#allocation2 + $0x16f] sm:$0x1] %v5057_v1  ;;  %54 = vst [vmem:[#allocation2 + $0x187] sm:$0x1] %v5057_v1  ;;  %4159 = vmatpush3.bf16.msra.mxu1 %v4918_v12  ;;  %4080 = vmatprep.subr.bf16.mxu0 %v4919_v13  ;;  %v4931_v25 = vld [vmem:[%s6501_s1 + $0x70] sm:$0xff]   ;;  %v4935_v29 = vld [vmem:[%s6501_s1 + $0x78] sm:$0xff]  }
   0xe   :  { %55 = vst [vmem:[#allocation2 + $0x19f] sm:$0x1] %v5057_v1  ;;  %56 = vst [vmem:[#allocation2 + $0x1b7] sm:$0x1] %v5057_v1  ;;  %4160 = vmatprep.subr.bf16.mxu1 %v4920_v14  ;;  %v4932_v26 = vld [vmem:[%s6501_s1 + $0x130] sm:$0xff]   ;;  %v4936_v30 = vld [vmem:[%s6501_s1 + $0x138] sm:$0xff]  }
   0xf   :  { %57 = vst [vmem:[#allocation2 + $0x28] sm:$0x1] %v5057_v1  ;;  %58 = vst [vmem:[#allocation2 + $0x40] sm:$0x1] %v5057_v1  ;;  %v4933_v27 = vld [vmem:[%s6501_s1 + $0x30] sm:$0xff]   ;;  %v4937_v31 = vld [vmem:[%s6501_s1 + $0x38] sm:$0xff]  }
  0x10   :  { %59 = vst [vmem:[#allocation2 + $0x58] sm:$0x1] %v5057_v1  ;;  %60 = vst [vmem:[#allocation2 + $0x70] sm:$0x1] %v5057_v1  ;;  %4081 = vmatpush3.bf16.msra.mxu0 %v4921_v15  ;;  %v4934_v28 = vld [vmem:[%s6501_s1 + $0xf0] sm:$0xff]   ;;  %v4938_v32 = vld [vmem:[%s6501_s1 + $0xf8] sm:$0xff]  }
  0x11   :  { %61 = vst [vmem:[#allocation2 + $0x88] sm:$0x1] %v5057_v1  ;;  %62 = vst [vmem:[#allocation2 + $0xa0] sm:$0x1] %v5057_v1  ;;  %4161 = vmatpush3.bf16.msra.mxu1 %v4922_v16  ;;  %4082 = vmatprep.subr.bf16.mxu0 %v4923_v17  ;;  %v5241_v33 = vld [vmem:[%s6502_s0] sm:$0xff]  ;;  %v5246_v34 = vld [vmem:[%s6502_s0 + $0x8] sm:$0xff] }
  0x12   :  { %63 = vst [vmem:[#allocation2 + $0xb8] sm:$0x1] %v5057_v1  ;;  %64 = vst [vmem:[#allocation2 + $0xd0] sm:$0x1] %v5057_v1  ;;  %4162 = vmatprep.subr.bf16.mxu1 %v4924_v18  ;;  %v153_v35 = vpack.c.bf16 %v5241_v33, %v5057_v1  ;;  %v675_v36 = vpack.c.bf16 %v5246_v34, %v5241_v33  ;;  %v4939_v37 = vld [vmem:[%s6501_s1 + $0x80] sm:$0xff]   ;;  %v5260_v38 = vld [vmem:[%s6502_s0 + $0x10] sm:$0xff] }
  0x13   :  { %65 = vst [vmem:[#allocation2 + $0x118] sm:$0x1] %v5057_v1  ;;  %66 = vst [vmem:[#allocation2 + $0x130] sm:$0x1] %v5057_v1  ;;  %v5265_v39 = vld [vmem:[%s6502_s0 + $0x18] sm:$0xff]  ;;  %v5272_v40 = vld [vmem:[%s6502_s0 + $0x20] sm:$0xff]  ;;  %v5305_v49 = vpack.c.bf16 %v5260_v38, %v5246_v34 }
  0x14   :  { %67 = vst [vmem:[#allocation2 + $0x148] sm:$0x1] %v5057_v1  ;;  %68 = vst [vmem:[#allocation2 + $0x160] sm:$0x1] %v5057_v1  ;;  %4083 = vmatpush3.bf16.msra.mxu0 %v4925_v19  ;;  %449 = vmatprep.mubr.bf16.mxu0 %v153_v35  ;;  %v5278_v41 = vld [vmem:[%s6502_s0 + $0x28] sm:$0xff]  ;;  %v5284_v42 = vld [vmem:[%s6502_s0 + $0x30] sm:$0xff]  ;;  %v676_v52 = vpack.c.bf16 %v5265_v39, %v5260_v38  ;;  %v5340_v63 = vpack.c.bf16 %v5272_v40, %v5265_v39 }
  0x15   :  { %69 = vst [vmem:[#allocation2 + $0x178] sm:$0x1] %v5057_v1  ;;  %70 = vst [vmem:[#allocation2 + $0x190] sm:$0x1] %v5057_v1  ;;  %4163 = vmatpush3.bf16.msra.mxu1 %v4926_v20  ;;  %4084 = vmatprep.subr.bf16.mxu0 %v4927_v21  ;;  %v5289_v43 = vld [vmem:[%s6502_s0 + $0x38] sm:$0xff]  ;;  %v105_v44 = vld [vmem:[#allocation2 + $0x7] sm:$0xff]  ;;  %v677_v0 = vpack.c.bf16 %v5278_v41, %v5272_v40  ;;  %v5386_v14 = vpack.c.bf16 %v5284_v42, %v5278_v41 }
  0x16   :  { %71 = vst [vmem:[#allocation2 + $0x1a8] sm:$0x1] %v5057_v1  ;;  %72 = vst [vmem:[#allocation2 + $0x1c0] sm:$0x1] %v5057_v1  ;;  %4164 = vmatprep.subr.bf16.mxu1 %v4928_v22  ;;  %972 = vmatprep.mubr.bf16.mxu1 %v675_v36  ;;  %v5296_v45 = vld [vmem:[%s6502_s0 + $0x40] sm:$0xff]  ;;  %v5301_v46 = vld [vmem:[%s6502_s0 + $0x48] sm:$0xff]  ;;  %v678_v15 = vpack.c.bf16 %v5289_v43, %v5284_v42 }
  0x17   :  { %89 = vst [vmem:[#allocation2 + $0x20] sm:$0xff] %v5241_v33  ;;  %90 = vst [vmem:[#allocation2 + $0x38] sm:$0xff] %v5246_v34  ;;  %v4940_v53 = vld [vmem:[%s6501_s1 + $0x88] sm:$0xff]   ;;  %v4944_v55 = vld [vmem:[%s6501_s1 + $0x140] sm:$0xff]  }
  0x18   :  { %4085 = vmatpush3.bf16.msra.mxu0 %v4929_v23  ;;  %91 = vst [vmem:[#allocation2 + $0x50] sm:$0xff] %v5260_v38  ;;  %92 = vst [vmem:[#allocation2 + $0x68] sm:$0xff] %v5265_v39  ;;  %v4945_v57 = vld [vmem:[%s6501_s1 + $0x148] sm:$0xff]   ;;  %v4941_v58 = vld [vmem:[%s6501_s1 + $0x90] sm:$0xff]  }
  0x19   :  { %4165 = vmatpush3.bf16.msra.mxu1 %v4930_v24  ;;  %4086 = vmatprep.subr.bf16.mxu0 %v4931_v25  ;;  %6522 = vst [vmem:[#allocation5_spill] sm:$0xff] %v5272_v40  ;;  %93 = vst [vmem:[#allocation2 + $0x80] sm:$0xff] %v5272_v40  ;;  %v5327_v59 = vld [vmem:[%s6502_s0 + $0x50] sm:$0xff]  ;;  %v5333_v60 = vld [vmem:[%s6502_s0 + $0x58] sm:$0xff]  ;;  %v157_v24 = vpack.c.bf16 %v5296_v45, %v5057_v1  ;;  %v679_v25 = vpack.c.bf16 %v5301_v46, %v5296_v45 }
  0x1a   :  { %4166 = vmatprep.subr.bf16.mxu1 %v4932_v26  ;;  %6523 = vst [vmem:[#allocation6_spill] sm:$0xff] %v5278_v41  ;;  %94 = vst [vmem:[#allocation2 + $0x98] sm:$0xff] %v5278_v41  ;;  %v4942_v2 = vld [vmem:[%s6501_s1 + $0x98] sm:$0xff]   ;;  %v4947_v3 = vld [vmem:[%s6501_s1 + $0x150] sm:$0xff]   ;;  %v5428_v36 = vpack.c.bf16 %v5327_v59, %v5301_v46 }
  0x1b   :  { %6524 = vst [vmem:[#allocation7_spill] sm:$0xff] %v5284_v42  ;;  %6525 = vst [vmem:[#allocation8_spill] sm:$0xff] %v5289_v43  ;;  %v5353_v4 = vld [vmem:[%s6502_s0 + $0x60] sm:$0xff]  ;;  %v5358_v5 = vld [vmem:[%s6502_s0 + $0x68] sm:$0xff] }
  0x1c   :  { %4087 = vmatpush3.bf16.msra.mxu0 %v4933_v27  ;;  %95 = vst [vmem:[#allocation2 + $0xb0] sm:$0xff] %v5284_v42  ;;  %96 = vst [vmem:[#allocation2 + $0xc8] sm:$0xff] %v5289_v43  ;;  %v4943_v8 = vld [vmem:[%s6501_s1 + $0xa0] sm:$0xff]   ;;  %v4948_v9 = vld [vmem:[%s6501_s1 + $0x158] sm:$0xff]  }
  0x1d   :  { %4167 = vmatpush3.bf16.msra.mxu1 %v4934_v28  ;;  %4088 = vmatprep.subr.bf16.mxu0 %v4935_v29  ;;  %6526 = vst [vmem:[#allocation9_spill] sm:$0xff] %v5296_v45  ;;  %6527 = vst [vmem:[#allocation10_spill] sm:$0xff] %v5301_v46  ;;  %v5373_v10 = vld [vmem:[%s6502_s0 + $0x70] sm:$0xff]  ;;  %v5378_v11 = vld [vmem:[%s6502_s0 + $0x78] sm:$0xff] }
  0x1e   :  { %4168 = vmatprep.subr.bf16.mxu1 %v4936_v30  ;;  %v106_v47 = vld [vmem:[#allocation2 + $0x1f] sm:$0xff]  ;;  %v628_v48 = vld [vmem:[#allocation2 + $0x37] sm:$0xff]  ;;  %97 = vst [vmem:[#allocation2 + $0x110] sm:$0xff] %v5296_v45  ;;  %98 = vst [vmem:[#allocation2 + $0x128] sm:$0xff] %v5301_v46 }
  0x1f   :  { %v121_v50 = vpack.c.bf16 %v106_v47, %v105_v44  ;;  %v643_v51 = vpack.c.bf16 %v628_v48, %v106_v47  ;;  %v108_v54 = vld [vmem:[#allocation2 + $0x4f] sm:$0xff]  ;;  %v630_v56 = vld [vmem:[#allocation2 + $0x67] sm:$0xff]  ;;  %6528 = vst [vmem:[#allocation11_spill] sm:$0xff] %v5327_v59  ;;  %99 = vst [vmem:[#allocation2 + $0x140] sm:$0xff] %v5327_v59 }
  0x20   :  { %4089 = vmatpush3.bf16.msra.mxu0 %v4937_v31  ;;  %6529 = vst [vmem:[#allocation12_spill] sm:$0xff] %v5333_v60  ;;  %v5335_v61 = vpack.c.bf16 %v108_v54, %v628_v48  ;;  %v644_v62 = vpack.c.bf16 %v630_v56, %v108_v54  ;;  %100 = vst [vmem:[#allocation2 + $0x158] sm:$0xff] %v5333_v60  ;;  %v110_v6 = vld [vmem:[#allocation2 + $0x7f] sm:$0xff]  ;;  %v4946_v16 = vld [vmem:[%s6501_s1 + $0xa8] sm:$0xff]  }
  0x21   :  { %4169 = vmatpush3.bf16.msra.mxu1 %v4938_v32  ;;  %4554 = vmatprep.subr.bf16.mxu0 %v4939_v37  ;;  %6530 = vst [vmem:[#allocation13_spill] sm:$0xff] %v5353_v4  ;;  %6531 = vst [vmem:[#allocation14_spill] sm:$0xff] %v5358_v5  ;;  %v632_v7 = vld [vmem:[#allocation2 + $0x97] sm:$0xff]  ;;  %v5380_v12 = vpack.c.bf16 %v110_v6, %v630_v56  ;;  %v4950_v17 = vld [vmem:[%s6501_s1 + $0x160] sm:$0xff]  }
  0x22   :  { %4586 = vmatprep.subr.bf16.mxu1 %v4944_v55  ;;  %101 = vst [vmem:[#allocation2 + $0x170] sm:$0xff] %v5353_v4  ;;  %102 = vst [vmem:[#allocation2 + $0x188] sm:$0xff] %v5358_v5  ;;  %v645_v13 = vpack.c.bf16 %v632_v7, %v110_v6  ;;  %v4949_v20 = vld [vmem:[%s6501_s1 + $0xb0] sm:$0xff]   ;;  %v4951_v21 = vld [vmem:[%s6501_s1 + $0x168] sm:$0xff]  }
  0x23   :  { %450 = vmatmul.mubr.bf16.vlgmr.msra.gmra.mrb[0].mxu0 %v121_v50  ;;  %6532 = vst [vmem:[#allocation15_spill] sm:$0xff] %v5373_v10  ;;  %6533 = vst [vmem:[#allocation16_spill] sm:$0xff] %v5378_v11  ;;  %v112_v18 = vld [vmem:[#allocation2 + $0xaf] sm:$0xff]  ;;  %v5398_v19 = vld [vmem:[#allocation2 + $0xc7] sm:$0xff] }
  0x24   :  { %973 = vmatmul.mubr.bf16.vlgmr.msra.gmra.mrb[0].mxu1 %v643_v51  ;;  %4555 = vmatpush3.bf16.msra.mxu0 %v4939_v37  ;;  %103 = vst [vmem:[#allocation2 + $0x1a0] sm:$0xff] %v5373_v10  ;;  %104 = vst [vmem:[#allocation2 + $0x1b8] sm:$0xff] %v5378_v11  ;;  %v5406_v22 = vpack.c.bf16 %v112_v18, %v632_v7  ;;  %v646_v23 = vpack.c.bf16 %v5398_v19, %v112_v18  ;;  %v4952_v26 = vld [vmem:[%s6501_s1 + $0xb8] sm:$0xff]   ;;  %v4953_v27 = vld [vmem:[%s6501_s1 + $0x170] sm:$0xff]  }
  0x25   :  { %457 = vmatprep.mubr.bf16.mxu0 %v5305_v49  ;;  %980 = vmatprep.mubr.bf16.mxu1 %v676_v52  ;;  %v113_v28 = vld [vmem:[#allocation2 + $0xf7] sm:$0xff]  ;;  %v114_v1 = vld [vmem:[#allocation2 + $0x10f] sm:$0xff]  ;;  %v636_v29 = vld [vmem:[#allocation2 + $0x127] sm:$0xff]  ;;  %v680_v37 = vpack.c.bf16 %v5333_v60, %v5327_v59  ;;  %v5440_v52 = vpack.c.bf16 %v5353_v4, %v5333_v60 }
  0x26   :  { %4556 = vmatprep.subr.bf16.mxu0 %v4940_v53  ;;  %4587 = vmatpush3.bf16.msra.mxu1 %v4944_v55  ;;  %v4954_v30 = vld [vmem:[%s6501_s1 + $0x178] sm:$0xff]   ;;  %v4955_v31 = vld [vmem:[%s6501_s1 + $0x1c0] sm:$0xff]   ;;  %v125_v32 = vpack.c.bf16 %v114_v1, %v113_v28  ;;  %v647_v35 = vpack.c.bf16 %v636_v29, %v114_v1  ;;  %v4960_v1 = vld [vmem:[%s6501_s1 + $0x188] sm:$0xff]  }
  0x27   :  { %4588 = vmatprep.subr.bf16.mxu1 %v4945_v57  ;;  %v4956_v44 = vld [vmem:[%s6501_s1 + $0x200] sm:$0xff]   ;;  %v638_v48 = vld [vmem:[#allocation2 + $0x157] sm:$0xff] }
  0x28   :  { %4557 = vmatpush3.bf16.msra.mxu0 %v4940_v53  ;;  %v116_v47 = vld [vmem:[#allocation2 + $0x13f] sm:$0xff]  ;;  %v681_v53 = vpack.c.bf16 %v5358_v5, %v5353_v4 }
  0x29   :  { %4558 = vmatprep.subr.bf16.mxu0 %v4941_v58  ;;  %v5436_v50 = vpack.c.bf16 %v116_v47, %v636_v29  ;;  %v648_v51 = vpack.c.bf16 %v638_v48, %v116_v47  ;;  %v118_v54 = vld [vmem:[#allocation2 + $0x16f] sm:$0xff]  ;;  %v640_v55 = vld [vmem:[#allocation2 + $0x187] sm:$0xff]  ;;  %v692_v7 = vld [vmem:[#allocation2 + $0x39] sm:$0xff] }
  0x2a   :  { %4589 = vmatpush3.bf16.msra.mxu1 %v4945_v57  ;;  %v5446_v56 = vpack.c.bf16 %v118_v54, %v638_v48  ;;  %v649_v57 = vpack.c.bf16 %v640_v55, %v118_v54  ;;  %v170_v6 = vld [vmem:[#allocation2 + $0x21] sm:$0xff]  ;;  %v176_v29 = vld [vmem:[#allocation2 + $0xb1] sm:$0xff]  ;;  %v700_v48 = vld [vmem:[#allocation2 + $0x129] sm:$0xff] }
  0x2b   :  { %458 = vmatmul.mubr.bf16.gmra.mrb[4].mxu0 %v5335_v61  ;;  %4590 = vmatprep.subr.bf16.mxu1 %v4947_v3  ;;  %v178_v47 = vld [vmem:[#allocation2 + $0x111] sm:$0xff]  ;;  %v5013_v40 = vld [vmem:[%s6503_s4 + $0x1c0] sm:$0xff]  }
  0x2c   :  { %981 = vmatmul.mubr.bf16.gmra.mrb[4].mxu1 %v644_v62  ;;  %465 = vmatprep.mubr.bf16.mxu0 %v5340_v63  ;;  %v682_v62 = vpack.c.bf16 %v5378_v11, %v5373_v10  ;;  %v4965_v54 = vld [vmem:[%s6501_s1 + $0x218] sm:$0xff]  }
  0x2d   :  { %988 = vmatprep.mubr.bf16.mxu1 %v677_v0  ;;  %4559 = vmatpush3.bf16.msra.mxu0 %v4941_v58  ;;  %v5450_v58 = vpack.c.bf16 %v5373_v10, %v5358_v5  ;;  %v120_v0 = vld [vmem:[#allocation2 + $0x19f] sm:$0xff]  ;;  %v5031_v10 = vld [vmem:[%s6503_s4 + $0x128] sm:$0xff]  }
  0x2e   :  { %4560 = vmatprep.subr.bf16.mxu0 %v4942_v2  ;;  %4591 = vmatpush3.bf16.msra.mxu1 %v4947_v3  ;;  %v169_v3 = vld [vmem:[#allocation2 + $0x9] sm:$0xff]  ;;  %v5039_v42 = vld [vmem:[%s6503_s4 + $0x138] sm:$0xff]  }
  0x2f   :  { %4592 = vmatprep.subr.bf16.mxu1 %v4948_v9 }
  0x31   :  { %4561 = vmatpush3.bf16.msra.mxu0 %v4942_v2  ;;  %v5456_v2 = vld [vmem:[#allocation2 + $0x1b7] sm:$0xff] }
  0x32   :  { %4562 = vmatprep.subr.bf16.mxu0 %v4943_v8  ;;  %4593 = vmatpush3.bf16.msra.mxu1 %v4948_v9  ;;  %v650_v9 = vpack.c.bf16 %v5456_v2, %v120_v0 }
  0x33   :  { %466 = vmatmul.mubr.bf16.gmra.mrb[8].mxu0 %v5380_v12  ;;  %4594 = vmatprep.subr.bf16.mxu1 %v4950_v17 }
  0x34   :  { %989 = vmatmul.mubr.bf16.gmra.mrb[8].mxu1 %v645_v13  ;;  %473 = vmatprep.mubr.bf16.mxu0 %v5386_v14  ;;  %v185_v13 = vpack.c.bf16 %v170_v6, %v169_v3  ;;  %v702_v3 = vld [vmem:[#allocation2 + $0x159] sm:$0xff] }
  0x35   :  { %996 = vmatprep.mubr.bf16.mxu1 %v678_v15  ;;  %4563 = vmatpush3.bf16.msra.mxu0 %v4943_v8  ;;  %v5458_v8 = vpack.c.bf16 %v120_v0, %v640_v55  ;;  %v707_v15 = vpack.c.bf16 %v692_v7, %v170_v6  ;;  %v180_v0 = vld [vmem:[#allocation2 + $0x141] sm:$0xff] }
  0x36   :  { %4564 = vmatprep.subr.bf16.mxu0 %v4946_v16  ;;  %4595 = vmatpush3.bf16.msra.mxu1 %v4950_v17  ;;  %v694_v17 = vld [vmem:[#allocation2 + $0x69] sm:$0xff]  ;;  %v4967_v6 = vld [vmem:[%s6501_s1 + $0x1e0] sm:$0xff]  }
  0x37   :  { %4596 = vmatprep.subr.bf16.mxu1 %v4951_v21 }
  0x39   :  { %4565 = vmatpush3.bf16.msra.mxu0 %v4946_v16  ;;  %v172_v16 = vld [vmem:[#allocation2 + $0x51] sm:$0xff] }
  0x3a   :  { %4566 = vmatprep.subr.bf16.mxu0 %v4949_v20  ;;  %4597 = vmatpush3.bf16.msra.mxu1 %v4951_v21  ;;  %v5462_v18 = vpack.c.bf16 %v172_v16, %v692_v7  ;;  %v174_v21 = vld [vmem:[#allocation2 + $0x81] sm:$0xff] }
  0x3b   :  { %474 = vmatmul.mubr.bf16.gmra.mrb[12].mxu0 %v5406_v22  ;;  %4598 = vmatprep.subr.bf16.mxu1 %v4953_v27  ;;  %v4968_v7 = vld [vmem:[%s6501_s1 + $0x220] sm:$0xff]  }
  0x3c   :  { %997 = vmatmul.mubr.bf16.gmra.mrb[12].mxu1 %v646_v23  ;;  %481 = vmatprep.mubr.bf16.mxu0 %v157_v24  ;;  %v696_v23 = vld [vmem:[#allocation2 + $0x99] sm:$0xff] }
  0x3d   :  { %1004 = vmatprep.mubr.bf16.mxu1 %v679_v25  ;;  %4567 = vmatpush3.bf16.msra.mxu0 %v4949_v20  ;;  %v708_v20 = vpack.c.bf16 %v694_v17, %v172_v16  ;;  %v4957_v24 = vld [vmem:[%s6501_s1 + $0x180] sm:$0xff]   ;;  %v4958_v25 = vld [vmem:[%s6501_s1 + $0x1c8] sm:$0xff]   ;;  %v709_v28 = vpack.c.bf16 %v696_v23, %v174_v21 }
  0x3e   :  { %4568 = vmatprep.subr.bf16.mxu0 %v4952_v26  ;;  %4599 = vmatpush3.bf16.msra.mxu1 %v4953_v27  ;;  %v5473_v27 = vpack.c.bf16 %v174_v21, %v694_v17  ;;  %v704_v16 = vld [vmem:[#allocation2 + $0x189] sm:$0xff]  ;;  %v4969_v17 = vld [vmem:[%s6501_s1 + $0x1a0] sm:$0xff]  }
  0x3f   :  { %4600 = vmatprep.subr.bf16.mxu1 %v4954_v30  ;;  %v4971_v21 = vld [vmem:[%s6501_s1 + $0x228] sm:$0xff]  }
  0x41   :  { %4569 = vmatpush3.bf16.msra.mxu0 %v4952_v26  ;;  %v4959_v26 = vld [vmem:[%s6501_s1 + $0x208] sm:$0xff]  }
  0x42   :  { %4234 = vmatprep.subr.bf16.mxu0 %v4955_v31  ;;  %4601 = vmatpush3.bf16.msra.mxu1 %v4954_v30  ;;  %v5479_v30 = vld [vmem:[#allocation2 + $0xc9] sm:$0xff] }
  0x43   :  { %482 = vmatmul.mubr.bf16.gmra.mrb[16].mxu0 %v125_v32  ;;  %4618 = vmatprep.subr.bf16.mxu1 %v4956_v44  ;;  %v4961_v31 = vld [vmem:[%s6501_s1 + $0x1d0] sm:$0xff]  }
  0x44   :  { %1005 = vmatmul.mubr.bf16.gmra.mrb[16].mxu1 %v647_v35  ;;  %489 = vmatprep.mubr.bf16.mxu0 %v5428_v36  ;;  %v4962_v32 = vld [vmem:[%s6501_s1 + $0x210] sm:$0xff]   ;;  %v5488_v35 = vpack.c.bf16 %v176_v29, %v696_v23 }
  0x45   :  { %1012 = vmatprep.mubr.bf16.mxu1 %v680_v37  ;;  %v710_v37 = vpack.c.bf16 %v5479_v30, %v176_v29  ;;  %v4974_v29 = vld [vmem:[%s6501_s1 + $0x230] sm:$0xff]  }
  0x4b   :  { %490 = vmatmul.mubr.bf16.gmra.mrb[20].mxu0 %v5436_v50 }
  0x4c   :  { %1013 = vmatmul.mubr.bf16.gmra.mrb[20].mxu1 %v648_v51  ;;  %497 = vmatprep.mubr.bf16.mxu0 %v5440_v52  ;;  %v4963_v51 = vld [vmem:[%s6501_s1 + $0x190] sm:$0xff]  }
  0x4d   :  { %1020 = vmatprep.mubr.bf16.mxu1 %v681_v53  ;;  %v4964_v53 = vld [vmem:[%s6501_s1 + $0x1d8] sm:$0xff]  }
  0x53   :  { %498 = vmatmul.mubr.bf16.gmra.mrb[24].mxu0 %v5446_v56 }
  0x54   :  { %1021 = vmatmul.mubr.bf16.gmra.mrb[24].mxu1 %v649_v57  ;;  %505 = vmatprep.mubr.bf16.mxu0 %v5450_v58  ;;  %v711_v57 = vpack.c.bf16 %v700_v48, %v178_v47 }
  0x55   :  { %1028 = vmatprep.mubr.bf16.mxu1 %v682_v62  ;;  %v4966_v62 = vld [vmem:[%s6501_s1 + $0x198] sm:$0xff]  }
  0x5b   :  { %506 = vmatmul.mubr.bf16.gmra.mrb[28].mxu0 %v5458_v8 }
  0x5c   :  { %1029 = vmatmul.mubr.bf16.gmra.mrb[28].mxu1 %v650_v9  ;;  %4570 = vmatprep.mubr.bf16.mxu0 %v185_v13  ;;  %v190_v9 = vpack.c.bf16 %v180_v0, %v700_v48  ;;  %v712_v13 = vpack.c.bf16 %v702_v3, %v180_v0  ;;  %v4978_v48 = vld [vmem:[%s6501_s1 + $0x1b8] sm:$0xff]  }
  0x5d   :  { %4602 = vmatprep.mubr.bf16.mxu1 %v707_v15  ;;  %v182_v15 = vld [vmem:[#allocation2 + $0x171] sm:$0xff] }
  0x5e   :  { %v191_v23 = vpack.c.bf16 %v182_v15, %v702_v3 }
  0x63   :  { %4571 = vmatmul.mubr.bf16.vlgmr.msra.gmra.mrb[32].mxu0 %v5462_v18 }
  0x64   :  { %4603 = vmatmul.mubr.bf16.vlgmr.msra.gmra.mrb[32].mxu1 %v708_v20  ;;  %4235 = vmatpush3.bf16.msra.mxu0 %v4957_v24  ;;  %v4970_v20 = vld [vmem:[%s6501_s1 + $0x1e8] sm:$0xff]   ;;  %v713_v24 = vpack.c.bf16 %v704_v16, %v182_v15 }
  0x65   :  { %4619 = vmatpush3.bf16.msra.mxu1 %v4956_v44  ;;  %4236 = vmatprep.subr.bf16.mxu0 %v4958_v25  ;;  %v177_v44 = vld [vmem:[#allocation2 + $0xf9] sm:$0xff]  ;;  %v4972_v25 = vld [vmem:[%s6501_s1 + $0x1a8] sm:$0xff]  }
  0x66   :  { %4620 = vmatprep.subr.bf16.mxu1 %v4959_v26  ;;  %4574 = vmatprep.mubr.bf16.mxu0 %v5473_v27  ;;  %v189_v55 = vpack.c.bf16 %v178_v47, %v177_v44  ;;  %v4976_v44 = vld [vmem:[%s6501_s1 + $0x1f8] sm:$0xff]  }
  0x67   :  { %4606 = vmatprep.mubr.bf16.mxu1 %v709_v28  ;;  %v706_v28 = vld [vmem:[#allocation2 + $0x1b9] sm:$0xff] }
  0x68   :  { %4237 = vmatpush3.bf16.msra.mxu0 %v4960_v1  ;;  %v4973_v1 = vld [vmem:[%s6501_s1 + $0x1f0] sm:$0xff]   ;;  %v4977_v47 = vld [vmem:[%s6501_s1 + $0x238] sm:$0xff]  }
  0x69   :  { %4621 = vmatpush3.bf16.msra.mxu1 %v4959_v26  ;;  %4238 = vmatprep.subr.bf16.mxu0 %v4961_v31  ;;  %v184_v26 = vld [vmem:[#allocation2 + $0x1a1] sm:$0xff] }
  0x6a   :  { %4622 = vmatprep.subr.bf16.mxu1 %v4962_v32  ;;  %v192_v31 = vpack.c.bf16 %v184_v26, %v704_v16 }
  0x6b   :  { %4575 = vmatmul.mubr.bf16.gmra.mrb[36].mxu0 %v5488_v35 }
  0x6c   :  { %4607 = vmatmul.mubr.bf16.gmra.mrb[36].mxu1 %v710_v37  ;;  %4239 = vmatpush3.bf16.msra.mxu0 %v4963_v51  ;;  %v4975_v37 = vld [vmem:[%s6501_s1 + $0x1b0] sm:$0xff]   ;;  %v1254_v51 = vld [vmem:[#allocation2 + $0xe1] sm:$0xff] }
  0x6d   :  { %4623 = vmatpush3.bf16.msra.mxu1 %v4962_v32  ;;  %4240 = vmatprep.subr.bf16.mxu0 %v4964_v53  ;;  %v714_v32 = vpack.c.bf16 %v706_v28, %v184_v26  ;;  %v1266_v53 = vpack.c.bf16 %v1254_v51, %v5479_v30 }
  0x6e   :  { %4624 = vmatprep.subr.bf16.mxu1 %v4965_v54  ;;  %4578 = vmatprep.mubr.bf16.mxu0 %v189_v55 }
  0x6f   :  { %4610 = vmatprep.mubr.bf16.mxu1 %v711_v57 }
  0x70   :  { %4241 = vmatpush3.bf16.msra.mxu0 %v4966_v62 }
  0x71   :  { %4625 = vmatpush3.bf16.msra.mxu1 %v4965_v54  ;;  %4242 = vmatprep.subr.bf16.mxu0 %v4967_v6 }
  0x72   :  { %4626 = vmatprep.subr.bf16.mxu1 %v4968_v7 }
  0x73   :  { %4579 = vmatmul.mubr.bf16.gmra.mrb[40].mxu0 %v190_v9 }
  0x74   :  { %4611 = vmatmul.mubr.bf16.gmra.mrb[40].mxu1 %v712_v13  ;;  %4243 = vmatpush3.bf16.msra.mxu0 %v4969_v17 }
  0x75   :  { %4627 = vmatpush3.bf16.msra.mxu1 %v4968_v7  ;;  %4244 = vmatprep.subr.bf16.mxu0 %v4970_v20 }
  0x76   :  { %4628 = vmatprep.subr.bf16.mxu1 %v4971_v21  ;;  %4582 = vmatprep.mubr.bf16.mxu0 %v191_v23 }
  0x77   :  { %4614 = vmatprep.mubr.bf16.mxu1 %v713_v24 }
  0x78   :  { %4245 = vmatpush3.bf16.msra.mxu0 %v4972_v25 }
  0x79   :  { %4629 = vmatpush3.bf16.msra.mxu1 %v4971_v21  ;;  %4246 = vmatprep.subr.bf16.mxu0 %v4973_v1 }
  0x7a   :  { %4630 = vmatprep.subr.bf16.mxu1 %v4974_v29 }
  0x7b   :  { %4583 = vmatmul.mubr.bf16.gmra.mrb[44].mxu0 %v192_v31 }
  0x7c   :  { %4615 = vmatmul.mubr.bf16.gmra.mrb[44].mxu1 %v714_v32  ;;  %4247 = vmatpush3.bf16.msra.mxu0 %v4975_v37 }
  0x7d   :  { %4631 = vmatpush3.bf16.msra.mxu1 %v4974_v29  ;;  %4248 = vmatprep.subr.bf16.mxu0 %v4976_v44 }
  0x7e   :  { %4632 = vmatprep.subr.bf16.mxu1 %v4977_v47  ;;  %1528 = vmatprep.mubr.bf16.mxu0 %v5305_v49  ;;  %v5055_v49 = vld [vmem:[#allocation2 + $0x8] sm:$0xff] }
  0x7f   :  { %4634 = vmatprep.mubr.bf16.mxu1 %v5462_v18  ;;  %v1234_v18 = vpack.c.bf16 %v5055_v49, %v5289_v43 }
  0x80   :  { %4249 = vmatpush3.bf16.msra.mxu0 %v4978_v48 }
  0x81   :  { %4633 = vmatpush3.bf16.msra.mxu1 %v4977_v47 }
  0x83   :  { %1529 = vmatmul.mubr.bf16.vlgmr.msra.gmra.mrb[48].mxu0 %v5335_v61  ;;  %v1190_v61 = vld [vmem:[#allocation2 + $0xdf] sm:$0xff] }
  0x84   :  { %4635 = vmatmul.mubr.bf16.vlgmr.msra.gmra.mrb[32].mxu1 %v5473_v27  ;;  %1536 = vmatprep.mubr.bf16.mxu0 %v5340_v63  ;;  %v1262_v63 = vld [vmem:[#allocation2 + $0x1d1] sm:$0xff]  ;;  %v1202_v27 = vpack.c.bf16 %v1190_v61, %v5398_v19 }
  0x85   :  { %4638 = vmatprep.mubr.bf16.mxu1 %v5488_v35  ;;  %v1270_v35 = vpack.c.bf16 %v1262_v63, %v706_v28 }
  0x8b   :  { %1537 = vmatmul.mubr.bf16.gmra.mrb[52].mxu0 %v5380_v12  ;;  %v1238_v12 = vpack.c.bf16 %v5055_v49, %v5378_v11  ;;  %v5029_v11 = vld [vmem:[%s6503_s4 + $0xe0] sm:$0xff]  }
  0x8c   :  { %4639 = vmatmul.mubr.bf16.gmra.mrb[36].mxu1 %v1266_v53  ;;  %1544 = vmatprep.mubr.bf16.mxu0 %v5386_v14  ;;  %v1198_v14 = vld [vmem:[#allocation2 + $0x1cf] sm:$0xff] }
  0x8d   :  { %4642 = vmatprep.mubr.bf16.mxu1 %v190_v9  ;;  %v1206_v19 = vpack.c.bf16 %v1198_v14, %v5456_v2 }
  0x93   :  { %1545 = vmatmul.mubr.bf16.gmra.mrb[56].mxu0 %v5406_v22 }
  0x94   :  { %4643 = vmatmul.mubr.bf16.gmra.mrb[40].mxu1 %v191_v23  ;;  %1552 = vmatprep.mubr.bf16.mxu0 %v1234_v18 }
  0x95   :  { %4646 = vmatprep.mubr.bf16.mxu1 %v192_v31 }
  0x9b   :  { %1553 = vmatmul.mubr.bf16.gmra.mrb[60].mxu0 %v1202_v27 }
  0x9c   :  { %4647 = vmatmul.mubr.bf16.gmra.mrb[44].mxu1 %v1270_v35  ;;  %1560 = vmatprep.mubr.bf16.mxu0 %v5428_v36 }
  0xa3   :  { %1561 = vmatmul.mubr.bf16.gmra.mrb[64].mxu0 %v5436_v50 }
  0xa4   :  { %1568 = vmatprep.mubr.bf16.mxu0 %v5440_v52 }
  0xab   :  { %1569 = vmatmul.mubr.bf16.gmra.mrb[68].mxu0 %v5446_v56 }
  0xac   :  { %1576 = vmatprep.mubr.bf16.mxu0 %v5450_v58 }
  0xb3   :  { %1577 = vmatmul.mubr.bf16.gmra.mrb[72].mxu0 %v5458_v8 }
  0xb4   :  { %1584 = vmatprep.mubr.bf16.mxu0 %v1238_v12 }
  0xbb   :  { %1585 = vmatmul.mubr.bf16.gmra.mrb[76].mxu0 %v1206_v19 }
  0xf6   :  { %v4090_v22 = vpop.f32.mrb[0].mxu0 }
  0xf7   :  { %v4170_v30 = vpop.f32.mrb[0].mxu1  ;;  %v4091_v36 = vpop.f32.mrb[1].mxu0 }
  0xf8   :  { %v4171_v54 = vpop.f32.mrb[1].mxu1  ;;  %v5560_v50 = vadd.f32 %v4091_v36, %v4090_v22  ;;  %v4093_v52 = vpop.f32.mrb[2].mxu0 }
  0xf9   :  { %v5562_v55 = vadd.f32 %v4171_v54, %v4170_v30  ;;  %v4173_v56 = vpop.f32.mrb[2].mxu1  ;;  %v4094_v58 = vpop.f32.mrb[3].mxu0 }
  0xfa   :  { %v4174_v57 = vpop.f32.mrb[3].mxu1  ;;  %v5564_v62 = vadd.f32 %v4094_v58, %v4093_v52 }
  0xfb   :  { %v5566_v8 = vadd.f32 %v4174_v57, %v4173_v56 }
  0xfe   :  { %v4096_v0 = vpop.f32.mrb[4].mxu0 }
  0xff   :  { %v4176_v3 = vpop.f32.mrb[4].mxu1  ;;  %v4097_v2 = vpop.f32.mrb[5].mxu0 }
 0x100   :  { %v4177_v6 = vpop.f32.mrb[5].mxu1  ;;  %v5568_v7 = vadd.f32 %v4097_v2, %v4096_v0  ;;  %v4099_v9 = vpop.f32.mrb[6].mxu0 }
 0x101   :  { %v5570_v13 = vadd.f32 %v4177_v6, %v4176_v3  ;;  %v4179_v15 = vpop.f32.mrb[6].mxu1  ;;  %v4100_v16 = vpop.f32.mrb[7].mxu0 }
 0x102   :  { %v4180_v17 = vpop.f32.mrb[7].mxu1  ;;  %v5572_v20 = vadd.f32 %v4100_v16, %v4099_v9 }
 0x103   :  { %v5574_v21 = vadd.f32 %v4180_v17, %v4179_v15 }
 0x106   :  { %v4102_v23 = vpop.f32.mrb[8].mxu0 }
 0x107   :  { %v4182_v24 = vpop.f32.mrb[8].mxu1  ;;  %v4103_v25 = vpop.f32.mrb[9].mxu0 }
 0x108   :  { %v4183_v26 = vpop.f32.mrb[9].mxu1  ;;  %v5576_v28 = vadd.f32 %v4103_v25, %v4102_v23  ;;  %v4105_v1 = vpop.f32.mrb[10].mxu0 }
 0x109   :  { %v5578_v29 = vadd.f32 %v4183_v26, %v4182_v24  ;;  %v4185_v31 = vpop.f32.mrb[10].mxu1  ;;  %v4106_v32 = vpop.f32.mrb[11].mxu0 }
 0x10a   :  { %v4186_v37 = vpop.f32.mrb[11].mxu1  ;;  %v5580_v44 = vadd.f32 %v4106_v32, %v4105_v1 }
 0x10b   :  { %v5582_v47 = vadd.f32 %v4186_v37, %v4185_v31 }
 0x10e   :  { %v4108_v48 = vpop.f32.mrb[12].mxu0 }
 0x10f   :  { %v4188_v51 = vpop.f32.mrb[12].mxu1  ;;  %v4109_v53 = vpop.f32.mrb[13].mxu0 }
 0x110   :  { %v4189_v49 = vpop.f32.mrb[13].mxu1  ;;  %v5584_v18 = vadd.f32 %v4109_v53, %v4108_v48  ;;  %v4111_v61 = vpop.f32.mrb[14].mxu0 }
 0x111   :  { %v5586_v63 = vadd.f32 %v4189_v49, %v4188_v51  ;;  %v4191_v27 = vpop.f32.mrb[14].mxu1  ;;  %v4112_v35 = vpop.f32.mrb[15].mxu0 }
 0x112   :  { %v4192_v12 = vpop.f32.mrb[15].mxu1  ;;  %v5588_v14 = vadd.f32 %v4112_v35, %v4111_v61 }
 0x113   :  { %v5590_v19 = vadd.f32 %v4192_v12, %v4191_v27 }
 0x116   :  { %v4114_v22 = vpop.f32.mrb[16].mxu0 }
 0x117   :  { %v4194_v30 = vpop.f32.mrb[16].mxu1  ;;  %v4115_v36 = vpop.f32.mrb[17].mxu0 }
 0x118   :  { %v4195_v54 = vpop.f32.mrb[17].mxu1  ;;  %v5592_v52 = vadd.f32 %v4115_v36, %v4114_v22  ;;  %v4117_v56 = vpop.f32.mrb[18].mxu0 }
 0x119   :  { %v5594_v58 = vadd.f32 %v4195_v54, %v4194_v30  ;;  %v4197_v57 = vpop.f32.mrb[18].mxu1  ;;  %v4118_v0 = vpop.f32.mrb[19].mxu0 }
 0x11a   :  { %v4198_v3 = vpop.f32.mrb[19].mxu1  ;;  %v5596_v2 = vadd.f32 %v4118_v0, %v4117_v56 }
 0x11b   :  { %v5598_v6 = vadd.f32 %v4198_v3, %v4197_v57 }
 0x11e   :  { %v4120_v9 = vpop.f32.mrb[20].mxu0 }
 0x11f   :  { %v4200_v15 = vpop.f32.mrb[20].mxu1  ;;  %v4121_v16 = vpop.f32.mrb[21].mxu0 }
 0x120   :  { %v4201_v17 = vpop.f32.mrb[21].mxu1  ;;  %v4122_v23 = vadd.f32 %v4121_v16, %v4120_v9  ;;  %v4123_v24 = vpop.f32.mrb[22].mxu0 }
 0x121   :  { %v4202_v25 = vadd.f32 %v4201_v17, %v4200_v15  ;;  %v4203_v26 = vpop.f32.mrb[22].mxu1  ;;  %v4124_v1 = vpop.f32.mrb[23].mxu0 }
 0x122   :  { %v4204_v31 = vpop.f32.mrb[23].mxu1  ;;  %v4125_v32 = vadd.f32 %v4124_v1, %v4123_v24 }
 0x123   :  { %v4205_v37 = vadd.f32 %v4204_v31, %v4203_v26 }
 0x126   :  { %v4126_v48 = vpop.f32.mrb[24].mxu0 }
 0x127   :  { %v4206_v51 = vpop.f32.mrb[24].mxu1  ;;  %v4127_v53 = vpop.f32.mrb[25].mxu0 }
 0x128   :  { %v4207_v49 = vpop.f32.mrb[25].mxu1  ;;  %v4128_v61 = vadd.f32 %v4127_v53, %v4126_v48  ;;  %v4129_v27 = vpop.f32.mrb[26].mxu0 }
 0x129   :  { %v4208_v35 = vadd.f32 %v4207_v49, %v4206_v51  ;;  %v4209_v12 = vpop.f32.mrb[26].mxu1  ;;  %v4130_v22 = vpop.f32.mrb[27].mxu0 }
 0x12a   :  { %v4210_v30 = vpop.f32.mrb[27].mxu1  ;;  %v4131_v36 = vadd.f32 %v4130_v22, %v4129_v27 }
 0x12b   :  { %v4211_v54 = vadd.f32 %v4210_v30, %v4209_v12 }
 0x12e   :  { %v4132_v56 = vpop.f32.mrb[28].mxu0 }
 0x12f   :  { %v4212_v57 = vpop.f32.mrb[28].mxu1  ;;  %v4133_v0 = vpop.f32.mrb[29].mxu0 }
 0x130   :  { %v4213_v3 = vpop.f32.mrb[29].mxu1  ;;  %v4134_v9 = vadd.f32 %v4133_v0, %v4132_v56  ;;  %v4135_v15 = vpop.f32.mrb[30].mxu0 }
 0x131   :  { %v4214_v16 = vadd.f32 %v4213_v3, %v4212_v57  ;;  %v4215_v17 = vpop.f32.mrb[30].mxu1  ;;  %v4136_v24 = vpop.f32.mrb[31].mxu0 }
 0x132   :  { %v4216_v26 = vpop.f32.mrb[31].mxu1  ;;  %v4137_v1 = vadd.f32 %v4136_v24, %v4135_v15 }
 0x133   :  { %v4217_v31 = vadd.f32 %v4216_v26, %v4215_v17 }
 0x136   :  { %v4572_v48 = vpop.f32.mrb[32].mxu0 }
 0x137   :  { %v557_v51 = vadd.f32 %v4572_v48, %v5568_v7  ;;  %v548_v53 = vpop.f32.mrb[33].mxu0 }
 0x138   :  { %v549_v49 = vadd.f32 %v5560_v50, %v548_v53  ;;  %v4573_v27 = vpop.f32.mrb[34].mxu0 }
 0x139   :  { %v5603_v12 = vadd.f32 %v5570_v13, %v557_v51  ;;  %v560_v22 = vadd.f32 %v4573_v27, %v5572_v20  ;;  %v551_v30 = vpop.f32.mrb[35].mxu0 }
 0x13a   :  { %v4751_v56 = vadd.f32 %v5562_v55, %v549_v49  ;;  %v552_v57 = vadd.f32 %v5564_v62, %v551_v30 }
 0x13b   :  { %v5609_v0 = vadd.f32 %v5574_v21, %v560_v22 }
 0x13c   :  { %v4759_v3 = vadd.f32 %v5566_v8, %v552_v57 }
 0x13e   :  { %v4576_v7 = vpop.f32.mrb[36].mxu0 }
 0x13f   :  { %v573_v15 = vadd.f32 %v4576_v7, %v5584_v18  ;;  %v564_v50 = vpop.f32.mrb[37].mxu0 }
 0x140   :  { %v565_v17 = vadd.f32 %v5576_v28, %v564_v50  ;;  %v4577_v13 = vpop.f32.mrb[38].mxu0 }
 0x141   :  { %v5615_v24 = vadd.f32 %v5586_v63, %v573_v15  ;;  %v576_v20 = vadd.f32 %v4577_v13, %v5588_v14  ;;  %v567_v55 = vpop.f32.mrb[39].mxu0 }
 0x142   :  { %v5619_v62 = vadd.f32 %v5578_v29, %v565_v17  ;;  %v568_v21 = vadd.f32 %v5580_v44, %v567_v55 }
 0x143   :  { %v5623_v8 = vadd.f32 %v5590_v19, %v576_v20 }
 0x144   :  { %v5626_v18 = vadd.f32 %v5582_v47, %v568_v21 }
 0x146   :  { %v4580_v26 = vpop.f32.mrb[40].mxu0 }
 0x147   :  { %v589_v28 = vadd.f32 %v4580_v26, %v4122_v23  ;;  %v580_v48 = vpop.f32.mrb[41].mxu0 }
 0x148   :  { %v581_v63 = vadd.f32 %v5592_v52, %v580_v48  ;;  %v4581_v51 = vpop.f32.mrb[42].mxu0 }
 0x149   :  { %v5629_v53 = vadd.f32 %v4202_v25, %v589_v28  ;;  %v592_v14 = vadd.f32 %v4581_v51, %v4125_v32  ;;  %v583_v49 = vpop.f32.mrb[43].mxu0 }
 0x14a   :  { %v5632_v29 = vadd.f32 %v5594_v58, %v581_v63  ;;  %v584_v44 = vadd.f32 %v5596_v2, %v583_v49 }
 0x14b   :  { %v5635_v19 = vadd.f32 %v4205_v37, %v592_v14 }
 0x14c   :  { %v5638_v47 = vadd.f32 %v5598_v6, %v584_v44 }
 0x14e   :  { %v4584_v27 = vpop.f32.mrb[44].mxu0 }
 0x14f   :  { %v605_v23 = vadd.f32 %v4584_v27, %v4134_v9  ;;  %v596_v22 = vpop.f32.mrb[45].mxu0 }
 0x150   :  { %v597_v30 = vadd.f32 %v4128_v61, %v596_v22  ;;  %v4585_v52 = vpop.f32.mrb[46].mxu0 }
 0x151   :  { %v5640_v57 = vadd.f32 %v4214_v16, %v605_v23  ;;  %v608_v25 = vadd.f32 %v4585_v52, %v4137_v1  ;;  %v599_v32 = vpop.f32.mrb[47].mxu0  ;;  %v4980_v23 = vld [vmem:[%s6503_s4] sm:$0xff]  }
 0x152   :  { %v5642_v7 = vadd.f32 %v4208_v35, %v597_v30  ;;  %v600_v58 = vadd.f32 %v4131_v36, %v599_v32  ;;  %v4981_v52 = vld [vmem:[%s6503_s4 + $0x80] sm:$0xff]  }
 0x153   :  { %v5644_v15 = vadd.f32 %v4217_v31, %v608_v25  ;;  %4650 = vmatprep.subr.bf16.mxu1 %v4981_v52 }
 0x154   :  { %v5646_v2 = vadd.f32 %v4211_v54, %v600_v58  ;;  %4651 = vmatpush3.bf16.msra.mxu1 %v4981_v52 }
 0x156   :  { %v4250_v37 = vpop.f32.mrb[48].mxu0 }
 0x157   :  { %v4636_v50 = vpop.f32.mrb[32].mxu1  ;;  %v4251_v6 = vpop.f32.mrb[49].mxu0 }
 0x158   :  { %v1627_v17 = vpop.f32.mrb[33].mxu1  ;;  %v4252_v13 = vadd.f32 %v4251_v6, %v4250_v37  ;;  %v4253_v9 = vpop.f32.mrb[50].mxu0  ;;  %v4982_v37 = vld [vmem:[%s6503_s4 + $0x48] sm:$0xff]  }
 0x159   :  { %v4637_v20 = vpop.f32.mrb[34].mxu1  ;;  %v4254_v61 = vpop.f32.mrb[51].mxu0  ;;  %v4983_v6 = vld [vmem:[%s6503_s4 + $0x88] sm:$0xff]  }
 0x15a   :  { %v1630_v55 = vpop.f32.mrb[35].mxu1  ;;  %v4752_v16 = vadd.f32 %v4751_v56, %v4252_v13  ;;  %v4255_v21 = vadd.f32 %v4254_v61, %v4253_v9  ;;  %4652 = vmatprep.subr.bf16.mxu1 %v4983_v6 }
 0x15b   :  { %4653 = vmatpush3.bf16.msra.mxu1 %v4983_v6 }
 0x15c   :  { %v5648_v1 = vadd.f32 %v4752_v16, %v1627_v17  ;;  %v4760_v35 = vadd.f32 %v4759_v3, %v4255_v21  ;;  %v4979_v3 = vld [vmem:[%s6503_s4 + $0x40] sm:$0xff]   ;;  %v4984_v17 = vld [vmem:[%s6503_s4 + $0x8] sm:$0xff]  }
 0x15d   :  { %4314 = vmatprep.subr.bf16.mxu0 %v4979_v3 }
 0x15e   :  { %v5650_v26 = vadd.f32 %v4760_v35, %v1630_v55  ;;  %v4256_v36 = vpop.f32.mrb[52].mxu0  ;;  %4315 = vmatpush3.bf16.msra.mxu0 %v4980_v23  ;;  %v4989_v23 = vld [vmem:[%s6503_s4 + $0x98] sm:$0xff]  }
 0x15f   :  { %v5652_v31 = vpop.f32.mrb[36].mxu1  ;;  %v4257_v54 = vpop.f32.mrb[53].mxu0  ;;  %4316 = vmatprep.subr.bf16.mxu0 %v4982_v37 }
 0x160   :  { %v1643_v28 = vpop.f32.mrb[37].mxu1  ;;  %v1754_v48 = vadd.f32 %v5650_v26, %v5648_v1  ;;  %v4258_v63 = vadd.f32 %v4257_v54, %v4256_v36  ;;  %v4259_v51 = vpop.f32.mrb[54].mxu0  ;;  %v4985_v36 = vld [vmem:[%s6503_s4 + $0x50] sm:$0xff]  }
 0x161   :  { %v5656_v14 = vpop.f32.mrb[38].mxu1  ;;  %v4260_v49 = vpop.f32.mrb[55].mxu0  ;;  %v4986_v54 = vld [vmem:[%s6503_s4 + $0x90] sm:$0xff]  }
 0x162   :  { %v1646_v56 = vpop.f32.mrb[39].mxu1  ;;  %v4748_v44 = vadd.f32 %v5603_v12, %v4258_v63  ;;  %v4261_v27 = vadd.f32 %v4260_v49, %v4259_v51  ;;  %4317 = vmatpush3.bf16.msra.mxu0 %v4984_v17  ;;  %v4987_v51 = vld [vmem:[%s6503_s4 + $0x10] sm:$0xff]   ;;  %4654 = vmatprep.subr.bf16.mxu1 %v4986_v54 }
 0x163   :  { %4318 = vmatprep.subr.bf16.mxu0 %v4985_v36  ;;  %4655 = vmatpush3.bf16.msra.mxu1 %v4986_v54  ;;  %v4994_v54 = vld [vmem:[%s6503_s4 + $0x68] sm:$0xff]  }
 0x164   :  { %v5665_v22 = vadd.f32 %v4748_v44, %v4636_v50  ;;  %v4756_v30 = vadd.f32 %v5609_v0, %v4261_v27  ;;  %4656 = vmatprep.subr.bf16.mxu1 %v4989_v23 }
 0x166   :  { %v1755_v12 = vadd.f32 %v5665_v22, %v1754_v48  ;;  %v5672_v25 = vadd.f32 %v4756_v30, %v4637_v20  ;;  %v4262_v32 = vpop.f32.mrb[56].mxu0  ;;  %4319 = vmatpush3.bf16.msra.mxu0 %v4987_v51 }
 0x167   :  { %v5674_v58 = vpop.f32.mrb[40].mxu1  ;;  %v4263_v50 = vpop.f32.mrb[57].mxu0  ;;  %4657 = vmatpush3.bf16.msra.mxu1 %v4989_v23  ;;  %v4997_v23 = vld [vmem:[%s6503_s4 + $0x70] sm:$0xff]  }
 0x168   :  { %v5679_v0 = vpop.f32.mrb[41].mxu1  ;;  %v1756_v13 = vadd.f32 %v5672_v25, %v1755_v12  ;;  %v4264_v9 = vadd.f32 %v4263_v50, %v4262_v32  ;;  %v4265_v20 = vpop.f32.mrb[58].mxu0 }
 0x169   :  { %v5688_v61 = vpop.f32.mrb[42].mxu1  ;;  %v4266_v55 = vpop.f32.mrb[59].mxu0 }
 0x16a   :  { %v5690_v16 = vpop.f32.mrb[43].mxu1  ;;  %v4768_v21 = vadd.f32 %v5619_v62, %v4264_v9  ;;  %v4267_v35 = vadd.f32 %v4266_v55, %v4265_v20  ;;  %v4992_v9 = vld [vmem:[%s6503_s4 + $0xa0] sm:$0xff]  }
 0x16b   :  { %v4993_v20 = vld [vmem:[%s6503_s4 + $0x20] sm:$0xff]   ;;  %4658 = vmatprep.subr.bf16.mxu1 %v4992_v9 }
 0x16c   :  { %v5699_v48 = vadd.f32 %v4768_v21, %v1643_v28  ;;  %v4776_v63 = vadd.f32 %v5626_v18, %v4267_v35  ;;  %v4988_v28 = vld [vmem:[%s6503_s4 + $0x58] sm:$0xff]   ;;  %4659 = vmatpush3.bf16.msra.mxu1 %v4992_v9 }
 0x16d   :  { %4320 = vmatprep.subr.bf16.mxu0 %v4988_v28 }
 0x16e   :  { %v1757_v62 = vadd.f32 %v5699_v48, %v1756_v13  ;;  %v5706_v49 = vadd.f32 %v4776_v63, %v1646_v56  ;;  %v4268_v44 = vpop.f32.mrb[60].mxu0  ;;  %v4990_v56 = vld [vmem:[%s6503_s4 + $0x18] sm:$0xff]   ;;  %v4991_v13 = vld [vmem:[%s6503_s4 + $0x60] sm:$0xff]  }
 0x16f   :  { %v5708_v27 = vpop.f32.mrb[44].mxu1  ;;  %v4269_v3 = vpop.f32.mrb[61].mxu0  ;;  %4321 = vmatpush3.bf16.msra.mxu0 %v4990_v56  ;;  %v4998_v56 = vld [vmem:[%s6503_s4 + $0xb0] sm:$0xff]  }
 0x170   :  { %v5713_v18 = vpop.f32.mrb[45].mxu1  ;;  %v1758_v30 = vadd.f32 %v5706_v49, %v1757_v62  ;;  %v4270_v52 = vadd.f32 %v4269_v3, %v4268_v44  ;;  %v4271_v12 = vpop.f32.mrb[62].mxu0  ;;  %4322 = vmatprep.subr.bf16.mxu0 %v4991_v13 }
 0x171   :  { %v5722_v32 = vpop.f32.mrb[46].mxu1  ;;  %v4272_v37 = vpop.f32.mrb[63].mxu0 }
 0x172   :  { %v5724_v50 = vpop.f32.mrb[47].mxu1  ;;  %v4764_v6 = vadd.f32 %v5615_v24, %v4270_v52  ;;  %v4273_v17 = vadd.f32 %v4272_v37, %v4271_v12  ;;  %v5000_v52 = vld [vmem:[%s6503_s4 + $0x78] sm:$0xff]  }
 0x173   :  { %4323 = vmatpush3.bf16.msra.mxu0 %v4993_v20  ;;  %v5001_v37 = vld [vmem:[%s6503_s4 + $0xb8] sm:$0xff]  }
 0x174   :  { %v5737_v55 = vadd.f32 %v4764_v6, %v5652_v31  ;;  %v4772_v24 = vadd.f32 %v5623_v8, %v4273_v17  ;;  %v4995_v31 = vld [vmem:[%s6503_s4 + $0xa8] sm:$0xff]   ;;  %4324 = vmatprep.subr.bf16.mxu0 %v4994_v54 }
 0x175   :  { %v4996_v8 = vld [vmem:[%s6503_s4 + $0x28] sm:$0xff]   ;;  %4660 = vmatprep.subr.bf16.mxu1 %v4995_v31 }
 0x176   :  { %v1759_v21 = vadd.f32 %v5737_v55, %v1758_v30  ;;  %v5742_v35 = vadd.f32 %v4772_v24, %v5656_v14  ;;  %v4274_v36 = vpop.f32.mrb[64].mxu0  ;;  %v4999_v30 = vld [vmem:[%s6503_s4 + $0x30] sm:$0xff]   ;;  %4661 = vmatpush3.bf16.msra.mxu1 %v4995_v31 }
 0x177   :  { %v4275_v63 = vpop.f32.mrb[65].mxu0  ;;  %4325 = vmatpush3.bf16.msra.mxu0 %v4996_v8  ;;  %4662 = vmatprep.subr.bf16.mxu1 %v4998_v56 }
 0x178   :  { %v1760_v51 = vadd.f32 %v5742_v35, %v1759_v21  ;;  %v4276_v14 = vadd.f32 %v4275_v63, %v4274_v36  ;;  %v4277_v62 = vpop.f32.mrb[66].mxu0  ;;  %4326 = vmatprep.subr.bf16.mxu0 %v4997_v23 }
 0x179   :  { %v4278_v44 = vpop.f32.mrb[67].mxu0 }
 0x17a   :  { %v4784_v28 = vadd.f32 %v5632_v29, %v4276_v14  ;;  %v4279_v3 = vadd.f32 %v4278_v44, %v4277_v62  ;;  %4663 = vmatpush3.bf16.msra.mxu1 %v4998_v56 }
 0x17b   :  { %4327 = vmatpush3.bf16.msra.mxu0 %v4999_v30  ;;  %4664 = vmatprep.subr.bf16.mxu1 %v5001_v37 }
 0x17c   :  { %v5768_v29 = vadd.f32 %v4784_v28, %v5679_v0  ;;  %v4792_v12 = vadd.f32 %v5638_v47, %v4279_v3  ;;  %v5002_v0 = vld [vmem:[%s6503_s4 + $0x38] sm:$0xff]   ;;  %4328 = vmatprep.subr.bf16.mxu0 %v5000_v52 }
 0x17e   :  { %v1761_v6 = vadd.f32 %v5768_v29, %v1760_v51  ;;  %v5776_v17 = vadd.f32 %v4792_v12, %v5690_v16  ;;  %v4280_v13 = vpop.f32.mrb[68].mxu0  ;;  %v5786_v16 = vld [vmem:[%s6503_s4 + $0x140] sm:$0xff]   ;;  %4665 = vmatpush3.bf16.msra.mxu1 %v5001_v37 }
 0x17f   :  { %v4281_v9 = vpop.f32.mrb[69].mxu0  ;;  %4329 = vmatpush3.bf16.msra.mxu0 %v5002_v0  ;;  %4682 = vmatprep.subr.bf16.mxu1 %v5786_v16 }
 0x180   :  { %v1762_v47 = vadd.f32 %v5776_v17, %v1761_v6  ;;  %v4282_v20 = vadd.f32 %v4281_v9, %v4280_v13  ;;  %v4283_v24 = vpop.f32.mrb[70].mxu0 }
 0x181   :  { %v4284_v21 = vpop.f32.mrb[71].mxu0 }
 0x182   :  { %v4780_v36 = vadd.f32 %v5629_v53, %v4282_v20  ;;  %v4285_v54 = vadd.f32 %v4284_v21, %v4283_v24 }
 0x184   :  { %v4781_v63 = vadd.f32 %v4780_v36, %v5674_v58  ;;  %v4788_v31 = vadd.f32 %v5635_v19, %v4285_v54  ;;  %v5011_v54 = vld [vmem:[%s6503_s4 + $0x100] sm:$0xff]  }
 0x185   :  { %4394 = vmatprep.subr.bf16.mxu0 %v5011_v54 }
 0x186   :  { %v1763_v8 = vadd.f32 %v4781_v63, %v1762_v47  ;;  %v4789_v51 = vadd.f32 %v4788_v31, %v5688_v61  ;;  %v4286_v14 = vpop.f32.mrb[72].mxu0 }
 0x187   :  { %v4287_v62 = vpop.f32.mrb[73].mxu0 }
 0x188   :  { %v1764_v53 = vadd.f32 %v4789_v51, %v1763_v8  ;;  %v4288_v44 = vadd.f32 %v4287_v62, %v4286_v14  ;;  %v4289_v28 = vpop.f32.mrb[74].mxu0 }
 0x189   :  { %v4290_v3 = vpop.f32.mrb[75].mxu0 }
 0x18a   :  { %v4800_v23 = vadd.f32 %v5642_v7, %v4288_v44  ;;  %v4291_v56 = vadd.f32 %v4290_v3, %v4289_v28 }
 0x18c   :  { %v4801_v30 = vadd.f32 %v4800_v23, %v5713_v18  ;;  %v4808_v58 = vadd.f32 %v5646_v2, %v4291_v56 }
 0x18e   :  { %v1765_v52 = vadd.f32 %v4801_v30, %v1764_v53  ;;  %v4809_v19 = vadd.f32 %v4808_v58, %v5724_v50  ;;  %v4292_v12 = vpop.f32.mrb[76].mxu0 }
 0x18f   :  { %v4293_v37 = vpop.f32.mrb[77].mxu0 }
 0x190   :  { %v1766_v6 = vadd.f32 %v4809_v19, %v1765_v52  ;;  %v4294_v61 = vadd.f32 %v4293_v37, %v4292_v12  ;;  %v4295_v13 = vpop.f32.mrb[78].mxu0 }
 0x191   :  { %v4296_v0 = vpop.f32.mrb[79].mxu0 }
 0x192   :  { %v4796_v9 = vadd.f32 %v5640_v57, %v4294_v61  ;;  %v4297_v47 = vadd.f32 %v4296_v0, %v4295_v13 }
 0x194   :  { %v4797_v20 = vadd.f32 %v4796_v9, %v5708_v27  ;;  %v4804_v7 = vadd.f32 %v5644_v15, %v4297_v47 }
 0x196   :  { %v1767_v24 = vadd.f32 %v4797_v20, %v1766_v6  ;;  %v4805_v18 = vadd.f32 %v4804_v7, %v5722_v32 }
 0x198   :  { %v1768_v2 = vadd.f32 %v4805_v18, %v1767_v24 }
 0x19a   :  { %v1769_v21 = vrot.slane %v1768_v2, 4 }
 0x19c   :  { %v1770_v36 = vadd.f32 %v1769_v21, %v1768_v2 }
 0x19e   :  { %v1771_v50 = vrot.slane %v1770_v36, 2 }
 0x1a0   :  { %v1772_v31 = vadd.f32 %v1771_v50, %v1770_v36 }
 0x1a2   :  { %v1773_v8 = vrot.slane %v1772_v31, 1 }
 0x1a4   :  { %v1774_v57 = vadd.f32 %v1773_v8, %v1772_v31 }
 0x1a6   :  { %v1775_v14 = vmul.f32 0.0078125, %v1774_v57 }
 0x1a8   :  { %v5804_v27 = vsub.f32 %v5648_v1, %v1775_v14  ;;  %v5807_v15 = vsub.f32 %v5650_v26, %v1775_v14  ;;  %v5810_v32 = vsub.f32 %v5665_v22, %v1775_v14  ;;  %v5813_v62 = vsub.f32 %v5672_v25, %v1775_v14 }
 0x1a9   :  { %v5816_v53 = vsub.f32 %v5699_v48, %v1775_v14  ;;  %v5819_v44 = vsub.f32 %v5706_v49, %v1775_v14  ;;  %v5822_v28 = vsub.f32 %v5737_v55, %v1775_v14  ;;  %v5825_v1 = vsub.f32 %v5742_v35, %v1775_v14 }
 0x1aa   :  { %v5828_v26 = vsub.f32 %v5768_v29, %v1775_v14  ;;  %v5831_v22 = vsub.f32 %v5776_v17, %v1775_v14  ;;  %v5833_v25 = vsub.f32 %v4781_v63, %v1775_v14  ;;  %v5835_v3 = vsub.f32 %v4789_v51, %v1775_v14 }
 0x1ab   :  { %v5837_v48 = vsub.f32 %v4801_v30, %v1775_v14  ;;  %v5839_v49 = vsub.f32 %v4809_v19, %v1775_v14  ;;  %v5841_v23 = vsub.f32 %v4797_v20, %v1775_v14  ;;  %v5843_v55 = vsub.f32 %v4805_v18, %v1775_v14 }
 0x1ac   :  { %v1792_v35 = vmul.f32 %v5804_v27, %v5804_v27  ;;  %v1793_v29 = vmul.f32 %v5807_v15, %v5807_v15  ;;  %v1794_v17 = vmul.f32 %v5810_v32, %v5810_v32  ;;  %v1795_v51 = vmul.f32 %v5813_v62, %v5813_v62 }
 0x1ad   :  { %v1796_v30 = vmul.f32 %v5816_v53, %v5816_v53  ;;  %v1797_v52 = vmul.f32 %v5819_v44, %v5819_v44  ;;  %v1798_v12 = vmul.f32 %v5822_v28, %v5822_v28  ;;  %v1799_v6 = vmul.f32 %v5825_v1, %v5825_v1 }
 0x1ae   :  { %v1808_v63 = vadd.f32 %v1793_v29, %v1792_v35  ;;  %v1800_v13 = vmul.f32 %v5828_v26, %v5828_v26  ;;  %v1801_v9 = vmul.f32 %v5831_v22, %v5831_v22  ;;  %v1802_v20 = vmul.f32 %v5833_v25, %v5833_v25 }
 0x1af   :  { %v1803_v24 = vmul.f32 %v5835_v3, %v5835_v3  ;;  %v1804_v2 = vmul.f32 %v5837_v48, %v5837_v48  ;;  %v1805_v36 = vmul.f32 %v5839_v49, %v5839_v49  ;;  %v1806_v54 = vmul.f32 %v5841_v23, %v5841_v23 }
 0x1b0   :  { %v1809_v56 = vadd.f32 %v1808_v63, %v1794_v17  ;;  %v1807_v8 = vmul.f32 %v5843_v55, %v5843_v55 }
 0x1b2   :  { %v1810_v58 = vadd.f32 %v1809_v56, %v1795_v51 }
 0x1b4   :  { %v1811_v19 = vadd.f32 %v1810_v58, %v1796_v30 }
 0x1b6   :  { %v1812_v37 = vadd.f32 %v1811_v19, %v1797_v52  ;;  %v1835_v52 = vlaneseq }
 0x1b8   :  { %v1813_v61 = vadd.f32 %v1812_v37, %v1798_v12  ;;  %v5877_v19 = vshrl.u32 %v1835_v52, 7  ;;  %v1830_v12 = vld [vmem:[%s6504_s2] sm:$0x1] }
 0x1ba   :  { %v1814_v0 = vadd.f32 %v1813_v61, %v1799_v6  ;;  %v6509_v37 = vsub.s32 0, %v5877_v19 }
 0x1bc   :  { %v1815_v47 = vadd.f32 %v1814_v0, %v1800_v13 }
 0x1be   :  { %v1816_v7 = vadd.f32 %v1815_v47, %v1801_v9 }
 0x1c0   :  { %v1817_v18 = vadd.f32 %v1816_v7, %v1802_v20 }
 0x1c2   :  { %v1818_v21 = vadd.f32 %v1817_v18, %v1803_v24 }
 0x1c4   :  { %v1819_v50 = vadd.f32 %v1818_v21, %v1804_v2  ;;  %v3904_v21 = vld [vmem:[%s6505_s3] ss:$0 sm:$0xff] }
 0x1c6   :  { %v1820_v31 = vadd.f32 %v1819_v50, %v1805_v36 }
 0x1c8   :  { %v1821_v57 = vadd.f32 %v1820_v31, %v1806_v54 }
 0x1ca   :  { %v1822_v14 = vadd.f32 %v1821_v57, %v1807_v8 }
 0x1cc   :  { %v1823_v35 = vrot.slane %v1822_v14, 4 }
 0x1ce   :  { %v1824_v29 = vadd.f32 %v1823_v35, %v1822_v14 }
 0x1d0   :  { %v1825_v17 = vrot.slane %v1824_v29, 2 }
 0x1d2   :  { %v1826_v63 = vadd.f32 %v1825_v17, %v1824_v29 }
 0x1d4   :  { %v1827_v51 = vrot.slane %v1826_v63, 1 }
 0x1d6   :  { %v1828_v56 = vadd.f32 %v1827_v51, %v1826_v63 }
 0x1d8   :  { %v1829_v30 = vmul.f32 0.0078125, %v1828_v56 }
 0x1da   :  { %v1831_v58 = vadd.f32 1e-05, %v1829_v30 }
 0x1dc   :  { %5051 = vrsqrt.f32 %v1831_v58 }
 0x1e6   :  { %v5052_v6 = vpop.eup %5051 }
 0x1e7   :  { %v1833_v61 = vmul.f32 %v5052_v6, %v1830_v12 }
 0x1e9   :  { %v1838_v13 = vrot.slane %v1833_v61, %v6509_v37  ;;  %v5021_v37 = vld [vmem:[%s6503_s4 + $0xd0] sm:$0xff]  }
 0x1eb   :  { %v1840_v0 = vmul.f32 %v1838_v13, %v5804_v27  ;;  %v1841_v9 = vmul.f32 %v1838_v13, %v5807_v15  ;;  %v1842_v47 = vmul.f32 %v1838_v13, %v5810_v32  ;;  %v1843_v20 = vmul.f32 %v1838_v13, %v5813_v62 }
 0x1ec   :  { %v1844_v7 = vmul.f32 %v1838_v13, %v5816_v53  ;;  %v1845_v24 = vmul.f32 %v1838_v13, %v5819_v44  ;;  %v1846_v18 = vmul.f32 %v1838_v13, %v5822_v28  ;;  %v1847_v2 = vmul.f32 %v1838_v13, %v5825_v1 }
 0x1ed   :  { %v1848_v27 = vmul.f32 %v1838_v13, %v5828_v26  ;;  %v1849_v15 = vmul.f32 %v1838_v13, %v5831_v22  ;;  %v1850_v32 = vmul.f32 %v1838_v13, %v5833_v25  ;;  %v1851_v62 = vmul.f32 %v1838_v13, %v5835_v3 }
 0x1ee   :  { %v1852_v53 = vmul.f32 %v1838_v13, %v5837_v48  ;;  %v1853_v44 = vmul.f32 %v1838_v13, %v5839_v49  ;;  %v1854_v28 = vmul.f32 %v1838_v13, %v5841_v23  ;;  %v1855_v1 = vmul.f32 %v1838_v13, %v5843_v55 }
 0x1ef   :  { %v1863_v36 = vadd.f32 %v3904_v21, %v1840_v0  ;;  %v1864_v50 = vadd.f32 %v3904_v21, %v1841_v9  ;;  %v1865_v54 = vadd.f32 %v3904_v21, %v1842_v47  ;;  %v1866_v31 = vadd.f32 %v3904_v21, %v1843_v20 }
 0x1f0   :  { %v1867_v8 = vadd.f32 %v3904_v21, %v1844_v7  ;;  %v1868_v26 = vadd.f32 %v3904_v21, %v1845_v24  ;;  %v1869_v57 = vadd.f32 %v3904_v21, %v1846_v18  ;;  %v1870_v22 = vadd.f32 %v3904_v21, %v1847_v2  ;;  %v5940_v7 = vld [vmem:[#allocation2 + $0x8] sm:$0xff] }
 0x1f1   :  { %v1871_v14 = vadd.f32 %v3904_v21, %v1848_v27  ;;  %v1872_v25 = vadd.f32 %v3904_v21, %v1849_v15  ;;  %v1873_v35 = vadd.f32 %v3904_v21, %v1850_v32  ;;  %v1874_v3 = vadd.f32 %v3904_v21, %v1851_v62 }
 0x1f2   :  { %v1875_v29 = vadd.f32 %v3904_v21, %v1852_v53  ;;  %v1876_v48 = vadd.f32 %v3904_v21, %v1853_v44  ;;  %v1877_v17 = vadd.f32 %v3904_v21, %v1854_v28  ;;  %v1878_v49 = vadd.f32 %v3904_v21, %v1855_v1  ;;  %v1975_v1 = vld [vmem:[#allocation2 + $0x9] sm:$0xff] }
 0x1f3   :  { %v5904_v63 = vmax.f32 %v1863_v36, 0.0  ;;  %v5906_v23 = vmax.f32 %v1864_v50, 0.0  ;;  %v5908_v55 = vmax.f32 %v1865_v54, 0.0  ;;  %v5910_v51 = vmax.f32 %v1866_v31, 0.0  ;;  %v1911_v36 = vld [vmem:[#allocation2 + $0x7] sm:$0xff]  ;;  %v5023_v54 = vld [vmem:[%s6503_s4 + $0x118] sm:$0xff]  }
 0x1f4   :  { %v5912_v56 = vmax.f32 %v1867_v8, 0.0  ;;  %v5914_v30 = vmax.f32 %v1868_v26, 0.0  ;;  %v5916_v58 = vmax.f32 %v1869_v57, 0.0  ;;  %v5918_v52 = vmax.f32 %v1870_v22, 0.0 }
 0x1f5   :  { %v5920_v12 = vmax.f32 %v1871_v14, 0.0  ;;  %v5922_v6 = vmax.f32 %v1872_v25, 0.0  ;;  %v5924_v61 = vmax.f32 %v1873_v35, 0.0  ;;  %v5926_v13 = vmax.f32 %v1874_v3, 0.0  ;;  %1895 = vst [vmem:[#allocation2 + $0x20] sm:$0xff] %v5904_v63  ;;  %1896 = vst [vmem:[#allocation2 + $0x38] sm:$0xff] %v5906_v23 }
 0x1f6   :  { %1897 = vst [vmem:[#allocation2 + $0x50] sm:$0xff] %v5908_v55  ;;  %1898 = vst [vmem:[#allocation2 + $0x68] sm:$0xff] %v5910_v51  ;;  %v1891_v0 = vmax.f32 %v1875_v29, 0.0  ;;  %v1892_v9 = vmax.f32 %v1876_v48, 0.0  ;;  %v1893_v47 = vmax.f32 %v1877_v17, 0.0  ;;  %v1894_v20 = vmax.f32 %v1878_v49, 0.0 }
 0x1f7   :  { %1899 = vst [vmem:[#allocation2 + $0x80] sm:$0xff] %v5912_v56  ;;  %1900 = vst [vmem:[#allocation2 + $0x98] sm:$0xff] %v5914_v30  ;;  %v1959_v24 = vpack.c.bf16 %v5904_v63, %v5940_v7  ;;  %v5946_v18 = vpack.c.bf16 %v5908_v55, %v5906_v23  ;;  %v5950_v2 = vpack.c.bf16 %v5912_v56, %v5910_v51  ;;  %v5004_v29 = vld [vmem:[%s6503_s4 + $0x148] sm:$0xff]   ;;  %v5012_v48 = vld [vmem:[%s6503_s4 + $0xc0] sm:$0xff]  }
 0x1f8   :  { %1901 = vst [vmem:[#allocation2 + $0xb0] sm:$0xff] %v5916_v58  ;;  %1902 = vst [vmem:[#allocation2 + $0xc8] sm:$0xff] %v5918_v52  ;;  %v5954_v21 = vpack.c.bf16 %v5916_v58, %v5914_v30  ;;  %v5958_v27 = vpack.c.bf16 %v5924_v61, %v5922_v6  ;;  %v5961_v15 = vpack.c.bf16 %v1891_v0, %v5926_v13  ;;  %v5015_v49 = vld [vmem:[%s6503_s4 + $0x108] sm:$0xff]  }
 0x1f9   :  { %1903 = vst [vmem:[#allocation2 + $0x110] sm:$0xff] %v5920_v12  ;;  %1904 = vst [vmem:[#allocation2 + $0x128] sm:$0xff] %v5922_v6  ;;  %v5963_v32 = vpack.c.bf16 %v1893_v47, %v1892_v9  ;;  %2255 = vmatprep.mubr.bf16.mxu0 %v1959_v24  ;;  %v1963_v45 = vpack.c.bf16 %v5920_v12, %v5940_v7 }
 0x1fa   :  { %1905 = vst [vmem:[#allocation2 + $0x140] sm:$0xff] %v5924_v61  ;;  %1906 = vst [vmem:[#allocation2 + $0x158] sm:$0xff] %v5926_v13 }
 0x1fb   :  { %1907 = vst [vmem:[#allocation2 + $0x170] sm:$0xff] %v1891_v0  ;;  %1908 = vst [vmem:[#allocation2 + $0x188] sm:$0xff] %v1892_v9  ;;  %v5005_v0 = vld [vmem:[%s6503_s4 + $0x150] sm:$0xff]  }
 0x1fc   :  { %1909 = vst [vmem:[#allocation2 + $0x1a0] sm:$0xff] %v1893_v47  ;;  %1910 = vst [vmem:[#allocation2 + $0x1b8] sm:$0xff] %v1894_v20  ;;  %v5977_v31 = vld [vmem:[#allocation2 + $0x21] sm:$0xff]  ;;  %v5981_v26 = vld [vmem:[#allocation2 + $0x39] sm:$0xff] }
 0x1fd   :  { %v5979_v8 = vld [vmem:[#allocation2 + $0x1f] sm:$0xff]  ;;  %v1991_v57 = vpack.c.bf16 %v5977_v31, %v1975_v1  ;;  %v5985_v14 = vld [vmem:[#allocation2 + $0x51] sm:$0xff]  ;;  %v5987_v25 = vld [vmem:[#allocation2 + $0x69] sm:$0xff]  ;;  %v2513_v43 = vpack.c.bf16 %v5981_v26, %v5977_v31 }
 0x1fe   :  { %v1927_v22 = vpack.c.bf16 %v5979_v8, %v1911_v36  ;;  %v5989_v35 = vld [vmem:[#allocation2 + $0x81] sm:$0xff]  ;;  %v5993_v3 = vpack.c.bf16 %v5985_v14, %v5981_v26  ;;  %v6015_v9 = vld [vmem:[#allocation2 + $0x37] sm:$0xff]  ;;  %v6017_v47 = vld [vmem:[#allocation2 + $0x4f] sm:$0xff] }
 0x1ff   :  { %4666 = vmatprep.mubr.bf16.mxu1 %v1991_v57  ;;  %v6003_v17 = vpack.c.bf16 %v5989_v35, %v5987_v25  ;;  %v5017_v20 = vld [vmem:[%s6503_s4 + $0xc8] sm:$0xff]   ;;  %v6022_v24 = vld [vmem:[#allocation2 + $0x99] sm:$0xff]  ;;  %v6024_v1 = vld [vmem:[#allocation2 + $0xb1] sm:$0xff] }
 0x200   :  { %2256 = vmatmul.mubr.bf16.vlgmr.msra.gmra.mrb[80].mxu0 %v1927_v22  ;;  %4667 = vmatmul.mubr.bf16.vlgmr.msra.gmra.mrb[48].mxu1 %v5993_v3  ;;  %v1983_v36 = vld [vmem:[#allocation2 + $0xf9] sm:$0xff]  ;;  %v6029_v57 = vld [vmem:[#allocation2 + $0x111] sm:$0xff]  ;;  %v6033_v22 = vpack.c.bf16 %v6017_v47, %v6015_v9  ;;  %v6055_v50 = vld [vmem:[#allocation2 + $0x67] sm:$0xff] }
 0x201   :  { %2263 = vmatprep.mubr.bf16.mxu0 %v5946_v18  ;;  %4670 = vmatprep.mubr.bf16.mxu1 %v6003_v17  ;;  %v6057_v28 = vld [vmem:[#allocation2 + $0x7f] sm:$0xff]  ;;  %v6101_v5 = vld [vmem:[#allocation2 + $0x97] sm:$0xff]  ;;  %v6103_v4 = vld [vmem:[#allocation2 + $0xaf] sm:$0xff] }
 0x202   :  { %4683 = vmatpush3.bf16.msra.mxu1 %v5786_v16  ;;  %4395 = vmatpush3.bf16.msra.mxu0 %v5012_v48  ;;  %v5019_v16 = vld [vmem:[%s6503_s4 + $0x110] sm:$0xff]   ;;  %v6037_v48 = vpack.c.bf16 %v6024_v1, %v6022_v24  ;;  %v6064_v44 = vld [vmem:[#allocation2 + $0x141] sm:$0xff]  ;;  %v6117_v46 = vpack.c.bf16 %v6103_v4, %v6101_v5  ;;  %v5041_v31 = vld [vmem:[%s6503_s4 + $0xf8] sm:$0xff]  }
 0x203   :  { %4684 = vmatprep.subr.bf16.mxu1 %v5004_v29  ;;  %4396 = vmatprep.subr.bf16.mxu0 %v5015_v49  ;;  %v5006_v49 = vld [vmem:[%s6503_s4 + $0x158] sm:$0xff]   ;;  %v6108_v60 = vld [vmem:[#allocation2 + $0x189] sm:$0xff]  ;;  %v6110_v59 = vld [vmem:[#allocation2 + $0x1a1] sm:$0xff] }
 0x204   :  { %v6071_v53 = vld [vmem:[#allocation2 + $0x171] sm:$0xff] }
 0x205   :  { %v6138_v41 = vld [vmem:[#allocation2 + $0x10f] sm:$0xff] }
 0x206   :  { %4685 = vmatpush3.bf16.msra.mxu1 %v5004_v29  ;;  %4397 = vmatpush3.bf16.msra.mxu0 %v5017_v20  ;;  %v1995_v29 = vpack.c.bf16 %v6029_v57, %v1983_v36  ;;  %v5007_v20 = vld [vmem:[%s6503_s4 + $0x160] sm:$0xff]   ;;  %v6062_v36 = vld [vmem:[#allocation2 + $0x129] sm:$0xff] }
 0x207   :  { %4686 = vmatprep.subr.bf16.mxu1 %v5005_v0  ;;  %4398 = vmatprep.subr.bf16.mxu0 %v5019_v16  ;;  %v5025_v16 = vld [vmem:[%s6503_s4 + $0xd8] sm:$0xff]   ;;  %v6079_v62 = vpack.c.bf16 %v6064_v44, %v6062_v36 }
 0x208   :  { %2264 = vmatmul.mubr.bf16.gmra.mrb[84].mxu0 %v6033_v22  ;;  %4671 = vmatmul.mubr.bf16.gmra.mrb[52].mxu1 %v6037_v48 }
 0x209   :  { %2271 = vmatprep.mubr.bf16.mxu0 %v5950_v2  ;;  %4674 = vmatprep.mubr.bf16.mxu1 %v1995_v29  ;;  %v6069_v29 = vld [vmem:[#allocation2 + $0x159] sm:$0xff] }
 0x20a   :  { %4687 = vmatpush3.bf16.msra.mxu1 %v5005_v0  ;;  %4399 = vmatpush3.bf16.msra.mxu0 %v5021_v37  ;;  %v5027_v0 = vld [vmem:[%s6503_s4 + $0x120] sm:$0xff]   ;;  %v6075_v37 = vpack.c.bf16 %v6057_v28, %v6055_v50 }
 0x20b   :  { %4688 = vmatprep.subr.bf16.mxu1 %v5006_v49  ;;  %4400 = vmatprep.subr.bf16.mxu0 %v5023_v54  ;;  %v5008_v54 = vld [vmem:[%s6503_s4 + $0x168] sm:$0xff]  }
 0x20e   :  { %4689 = vmatpush3.bf16.msra.mxu1 %v5006_v49  ;;  %4401 = vmatpush3.bf16.msra.mxu0 %v5025_v16  ;;  %v6090_v49 = vpack.c.bf16 %v6071_v53, %v6069_v29  ;;  %v5009_v16 = vld [vmem:[%s6503_s4 + $0x170] sm:$0xff]  }
 0x20f   :  { %4690 = vmatprep.subr.bf16.mxu1 %v5007_v20  ;;  %4402 = vmatprep.subr.bf16.mxu0 %v5027_v0  ;;  %v5033_v0 = vld [vmem:[%s6503_s4 + $0xe8] sm:$0xff]  }
 0x210   :  { %2272 = vmatmul.mubr.bf16.gmra.mrb[88].mxu0 %v6075_v37  ;;  %4675 = vmatmul.mubr.bf16.gmra.mrb[56].mxu1 %v6079_v62 }
 0x211   :  { %2279 = vmatprep.mubr.bf16.mxu0 %v5954_v21  ;;  %4678 = vmatprep.mubr.bf16.mxu1 %v6090_v49 }
 0x212   :  { %4691 = vmatpush3.bf16.msra.mxu1 %v5007_v20  ;;  %4403 = vmatpush3.bf16.msra.mxu0 %v5029_v11  ;;  %v5035_v20 = vld [vmem:[%s6503_s4 + $0x130] sm:$0xff]   ;;  %v6121_v11 = vpack.c.bf16 %v6110_v59, %v6108_v60 }
 0x213   :  { %4692 = vmatprep.subr.bf16.mxu1 %v5008_v54  ;;  %4404 = vmatprep.subr.bf16.mxu0 %v5031_v10  ;;  %v5010_v10 = vld [vmem:[%s6503_s4 + $0x178] sm:$0xff]  }
 0x216   :  { %4693 = vmatpush3.bf16.msra.mxu1 %v5008_v54  ;;  %4405 = vmatpush3.bf16.msra.mxu0 %v5033_v0  ;;  %v5037_v54 = vld [vmem:[%s6503_s4 + $0xf0] sm:$0xff]  }
 0x217   :  { %4694 = vmatprep.subr.bf16.mxu1 %v5009_v16  ;;  %4406 = vmatprep.subr.bf16.mxu0 %v5035_v20  ;;  %v1919_v0 = vld [vmem:[#allocation2 + $0xf7] sm:$0xff]  ;;  %v5018_v20 = vld [vmem:[%s6503_s4 + $0x188] sm:$0xff]  }
 0x218   :  { %2280 = vmatmul.mubr.bf16.gmra.mrb[92].mxu0 %v6117_v46  ;;  %4679 = vmatmul.mubr.bf16.gmra.mrb[60].mxu1 %v6121_v11  ;;  %v1931_v26 = vpack.c.bf16 %v6138_v41, %v1919_v0  ;;  %v5024_v0 = vld [vmem:[%s6503_s4 + $0x1d8] sm:$0xff]  }
 0x219   :  { %2287 = vmatprep.mubr.bf16.mxu0 %v1963_v45  ;;  %4698 = vmatprep.mubr.bf16.mxu1 %v2513_v43  ;;  %v5014_v43 = vld [vmem:[%s6503_s4 + $0x180] sm:$0xff]   ;;  %v2514_v45 = vpack.c.bf16 %v5987_v25, %v5985_v14  ;;  %v5020_v25 = vld [vmem:[%s6503_s4 + $0x1d0] sm:$0xff]  }
 0x21a   :  { %4695 = vmatpush3.bf16.msra.mxu1 %v5009_v16  ;;  %4407 = vmatpush3.bf16.msra.mxu0 %v5037_v54  ;;  %v5016_v16 = vld [vmem:[%s6503_s4 + $0x1c8] sm:$0xff]   ;;  %v6163_v14 = vld [vmem:[#allocation2 + $0x13f] sm:$0xff] }
 0x21b   :  { %4696 = vmatprep.subr.bf16.mxu1 %v5010_v10  ;;  %4408 = vmatprep.subr.bf16.mxu0 %v5039_v42  ;;  %v2515_v42 = vpack.c.bf16 %v6022_v24, %v5989_v35  ;;  %v5022_v24 = vld [vmem:[%s6503_s4 + $0x190] sm:$0xff]  }
 0x21e   :  { %4697 = vmatpush3.bf16.msra.mxu1 %v5010_v10  ;;  %4409 = vmatpush3.bf16.msra.mxu0 %v5041_v31  ;;  %v6168_v10 = vld [vmem:[#allocation2 + $0xc9] sm:$0xff]  ;;  %v2517_v31 = vpack.c.bf16 %v6062_v36, %v6029_v57  ;;  %v2518_v36 = vpack.c.bf16 %v6069_v29, %v6064_v44  ;;  %v6217_v29 = vld [vmem:[#allocation2 + $0x19f] sm:$0xff] }
 0x21f   :  { %4474 = vmatprep.subr.bf16.mxu1 %v5013_v40  ;;  %v6161_v40 = vld [vmem:[#allocation2 + $0x127] sm:$0xff]  ;;  %v2516_v54 = vpack.c.bf16 %v6168_v10, %v6024_v1  ;;  %v6189_v1 = vld [vmem:[#allocation2 + $0x157] sm:$0xff] }
 0x220   :  { %2288 = vmatmul.mubr.bf16.gmra.mrb[96].mxu0 %v1931_v26  ;;  %v6172_v35 = vpack.c.bf16 %v6163_v14, %v6161_v40  ;;  %v5026_v26 = vld [vmem:[%s6503_s4 + $0x198] sm:$0xff]   ;;  %v6215_v44 = vld [vmem:[#allocation2 + $0x187] sm:$0xff] }
 0x221   :  { %4699 = vmatmul.mubr.bf16.vlgmr.msra.gmra.mrb[48].mxu1 %v2514_v45  ;;  %2295 = vmatprep.mubr.bf16.mxu0 %v5958_v27  ;;  %v5028_v45 = vld [vmem:[%s6503_s4 + $0x1e0] sm:$0xff]  }
 0x222   :  { %4702 = vmatprep.mubr.bf16.mxu1 %v2515_v42  ;;  %4475 = vmatpush3.bf16.msra.mxu1 %v5014_v43  ;;  %v6191_v43 = vld [vmem:[#allocation2 + $0x16f] sm:$0xff]  ;;  %v2519_v42 = vpack.c.bf16 %v6108_v60, %v6071_v53  ;;  %v6226_v60 = vpack.c.bf16 %v6217_v29, %v6215_v44 }
 0x223   :  { %4476 = vmatprep.subr.bf16.mxu1 %v5016_v16  ;;  %v6198_v57 = vpack.c.bf16 %v6191_v43, %v6189_v1  ;;  %v5032_v16 = vld [vmem:[%s6503_s4 + $0x1e8] sm:$0xff]  }
 0x226   :  { %4477 = vmatpush3.bf16.msra.mxu1 %v5018_v20  ;;  %v5034_v20 = vld [vmem:[%s6503_s4 + $0x1a8] sm:$0xff]  }
 0x227   :  { %4478 = vmatprep.subr.bf16.mxu1 %v5020_v25  ;;  %v5036_v25 = vld [vmem:[%s6503_s4 + $0x1f0] sm:$0xff]  }
 0x228   :  { %2296 = vmatmul.mubr.bf16.gmra.mrb[100].mxu0 %v6172_v35 }
 0x229   :  { %4703 = vmatmul.mubr.bf16.gmra.mrb[52].mxu1 %v2516_v54  ;;  %2303 = vmatprep.mubr.bf16.mxu0 %v5961_v15  ;;  %v5030_v15 = vld [vmem:[%s6503_s4 + $0x1a0] sm:$0xff]   ;;  %v5040_v54 = vld [vmem:[%s6503_s4 + $0x1f8] sm:$0xff]  }
 0x22a   :  { %4706 = vmatprep.mubr.bf16.mxu1 %v2517_v31  ;;  %4479 = vmatpush3.bf16.msra.mxu1 %v5022_v24  ;;  %v6222_v24 = vld [vmem:[#allocation2 + $0x1b9] sm:$0xff] }
 0x22b   :  { %4480 = vmatprep.subr.bf16.mxu1 %v5024_v0  ;;  %v2520_v53 = vpack.c.bf16 %v6222_v24, %v6110_v59  ;;  %v6534_v0 = vpack.c.bf16 %v5906_v23, %v5904_v63  ;;  %v5042_v31 = vld [vmem:[%s6503_s4 + $0x1b8] sm:$0xff]   ;;  %v5043_v59 = vld [vmem:[%s6503_s4 + $0x200] sm:$0xff]   ;;  %v5044_v63 = vld [vmem:[%s6503_s4 + $0x208] sm:$0xff]   ;;  %v6535_v23 = vpack.c.bf16 %v5910_v51, %v5908_v55  ;;  %v6536_v55 = vpack.c.bf16 %v5914_v30, %v5912_v56 }
 0x22c   :  { %v5047_v51 = vld [vmem:[%s6503_s4 + $0x220] sm:$0xff]   ;;  %v3039_v56 = vpack.c.bf16 %v5940_v7, %v5918_v52  ;;  %v6537_v30 = vpack.c.bf16 %v5918_v52, %v5916_v58  ;;  %v6538_v58 = vpack.c.bf16 %v5922_v6, %v5920_v12  ;;  %v3030_v52 = vld [vmem:[#allocation2 + $0x158] sm:$0xff]  ;;  %v2478_v12 = vld [vmem:[#allocation2 + $0x188] sm:$0xff] }
 0x22d   :  { %v3033_v6 = vld [vmem:[#allocation2 + $0x1a0] sm:$0xff] }
 0x22e   :  { %4481 = vmatpush3.bf16.msra.mxu1 %v5026_v26  ;;  %v2449_v26 = vpack.c.bf16 %v6015_v9, %v5979_v8  ;;  %v2450_v8 = vpack.c.bf16 %v6055_v50, %v6017_v47  ;;  %v5046_v9 = vld [vmem:[%s6503_s4 + $0x218] sm:$0xff]   ;;  %v5048_v50 = vld [vmem:[%s6503_s4 + $0x228] sm:$0xff]  }
 0x22f   :  { %4482 = vmatprep.subr.bf16.mxu1 %v5028_v45 }
 0x230   :  { %2304 = vmatmul.mubr.bf16.gmra.mrb[104].mxu0 %v6198_v57 }
 0x231   :  { %4707 = vmatmul.mubr.bf16.gmra.mrb[56].mxu1 %v2518_v36  ;;  %2311 = vmatprep.mubr.bf16.mxu0 %v5963_v32  ;;  %v5038_v32 = vld [vmem:[%s6503_s4 + $0x1b0] sm:$0xff]  }
 0x232   :  { %4710 = vmatprep.mubr.bf16.mxu1 %v2519_v42  ;;  %4483 = vmatpush3.bf16.msra.mxu1 %v5030_v15  ;;  %v6539_v15 = vpack.c.bf16 %v5926_v13, %v5924_v61  ;;  %v2448_v13 = vld [vmem:[#allocation2 + $0x1b7] sm:$0xff] }
 0x233   :  { %4484 = vmatprep.subr.bf16.mxu1 %v5032_v16  ;;  %v3042_v16 = vpack.c.bf16 %v3033_v6, %v2478_v12 }
 0x236   :  { %4485 = vmatpush3.bf16.msra.mxu1 %v5034_v20 }
 0x237   :  { %4486 = vmatprep.subr.bf16.mxu1 %v5036_v25 }
 0x238   :  { %2312 = vmatmul.mubr.bf16.gmra.mrb[108].mxu0 %v6226_v60 }
 0x239   :  { %4711 = vmatmul.mubr.bf16.gmra.mrb[60].mxu1 %v2520_v53  ;;  %2778 = vmatprep.mubr.bf16.mxu0 %v6534_v0 }
 0x23a   :  { %4487 = vmatpush3.bf16.msra.mxu1 %v5038_v32  ;;  %3333 = vmatprep.mubr.bf16.mxu1 %v5946_v18  ;;  %v5045_v18 = vld [vmem:[%s6503_s4 + $0x210] sm:$0xff]  }
 0x23b   :  { %4488 = vmatprep.subr.bf16.mxu1 %v5040_v54 }
 0x23e   :  { %4489 = vmatpush3.bf16.msra.mxu1 %v5042_v31 }
 0x23f   :  { %4714 = vmatprep.subr.bf16.mxu1 %v5043_v59 }
 0x240   :  { %2779 = vmatmul.mubr.bf16.vlgmr.msra.gmra.mrb[112].mxu0 %v2449_v26 }
 0x241   :  { %3334 = vmatmul.mubr.bf16.vlgmr.msra.gmra.mrb[64].mxu1 %v6033_v22  ;;  %2786 = vmatprep.mubr.bf16.mxu0 %v6535_v23 }
 0x242   :  { %3341 = vmatprep.mubr.bf16.mxu1 %v5950_v2  ;;  %4715 = vmatpush3.bf16.msra.mxu1 %v5043_v59  ;;  %v2451_v2 = vpack.c.bf16 %v6101_v5, %v6057_v28  ;;  %v5049_v5 = vld [vmem:[%s6503_s4 + $0x230] sm:$0xff]   ;;  %v2995_v28 = vld [vmem:[#allocation2 + $0xdf] sm:$0xff] }
 0x243   :  { %4716 = vmatprep.subr.bf16.mxu1 %v5044_v63 }
 0x246   :  { %4717 = vmatpush3.bf16.msra.mxu1 %v5044_v63 }
 0x247   :  { %4718 = vmatprep.subr.bf16.mxu1 %v5045_v18 }
 0x248   :  { %2787 = vmatmul.mubr.bf16.gmra.mrb[116].mxu0 %v2450_v8 }
 0x249   :  { %3342 = vmatmul.mubr.bf16.gmra.mrb[68].mxu1 %v6075_v37  ;;  %2794 = vmatprep.mubr.bf16.mxu0 %v6536_v55  ;;  %v3031_v37 = vld [vmem:[#allocation2 + $0x170] sm:$0xff] }
 0x24a   :  { %3349 = vmatprep.mubr.bf16.mxu1 %v5954_v21  ;;  %4719 = vmatpush3.bf16.msra.mxu1 %v5045_v18  ;;  %v2440_v21 = vld [vmem:[#allocation2 + $0xc7] sm:$0xff]  ;;  %v3041_v45 = vpack.c.bf16 %v3031_v37, %v3030_v52  ;;  %v2487_v36 = vpack.c.bf16 %v2478_v12, %v3031_v37 }
 0x24b   :  { %4720 = vmatprep.subr.bf16.mxu1 %v5046_v9  ;;  %v2452_v47 = vpack.c.bf16 %v2440_v21, %v6103_v4  ;;  %v3007_v22 = vpack.c.bf16 %v2995_v28, %v2440_v21  ;;  %v2453_v4 = vpack.c.bf16 %v6161_v40, %v6138_v41  ;;  %v2480_v41 = vld [vmem:[#allocation2 + $0x1b8] sm:$0xff]  ;;  %v2455_v40 = vpack.c.bf16 %v6215_v44, %v6191_v43  ;;  %v3059_v43 = vld [vmem:[#allocation2 + $0xe1] sm:$0xff] }
 0x24c   :  { %v3043_v61 = vpack.c.bf16 %v5940_v7, %v2480_v41  ;;  %v3071_v7 = vpack.c.bf16 %v3059_v43, %v6168_v10 }
 0x24e   :  { %4721 = vmatpush3.bf16.msra.mxu1 %v5046_v9 }
 0x24f   :  { %4722 = vmatprep.subr.bf16.mxu1 %v5047_v51 }
 0x250   :  { %2795 = vmatmul.mubr.bf16.gmra.mrb[120].mxu0 %v2451_v2 }
 0x251   :  { %3350 = vmatmul.mubr.bf16.gmra.mrb[72].mxu1 %v6117_v46  ;;  %2802 = vmatprep.mubr.bf16.mxu0 %v6537_v30  ;;  %v5050_v46 = vld [vmem:[%s6503_s4 + $0x238] sm:$0xff]  }
 0x252   :  { %3357 = vmatprep.mubr.bf16.mxu1 %v3039_v56  ;;  %4723 = vmatpush3.bf16.msra.mxu1 %v5047_v51 }
 0x253   :  { %4724 = vmatprep.subr.bf16.mxu1 %v5048_v50 }
 0x256   :  { %4725 = vmatpush3.bf16.msra.mxu1 %v5048_v50 }
 0x257   :  { %4726 = vmatprep.subr.bf16.mxu1 %v5049_v5 }
 0x258   :  { %2803 = vmatmul.mubr.bf16.gmra.mrb[124].mxu0 %v2452_v47 }
 0x259   :  { %3358 = vmatmul.mubr.bf16.gmra.mrb[76].mxu1 %v3007_v22  ;;  %2810 = vmatprep.mubr.bf16.mxu0 %v6538_v58 }
 0x25a   :  { %3365 = vmatprep.mubr.bf16.mxu1 %v5958_v27  ;;  %4727 = vmatpush3.bf16.msra.mxu1 %v5049_v5  ;;  %v2454_v27 = vpack.c.bf16 %v6189_v1, %v6163_v14  ;;  %v3003_v14 = vld [vmem:[#allocation2 + $0x1cf] sm:$0xff]  ;;  %v2456_v1 = vpack.c.bf16 %v2448_v13, %v6217_v29 }
 0x25b   :  { %4728 = vmatprep.subr.bf16.mxu1 %v5050_v46  ;;  %v3011_v42 = vpack.c.bf16 %v3003_v14, %v2448_v13 }
 0x25e   :  { %4729 = vmatpush3.bf16.msra.mxu1 %v5050_v46 }
 0x260   :  { %2811 = vmatmul.mubr.bf16.gmra.mrb[128].mxu0 %v2453_v4 }
 0x261   :  { %3366 = vmatmul.mubr.bf16.gmra.mrb[80].mxu1 %v6172_v35  ;;  %2818 = vmatprep.mubr.bf16.mxu0 %v6539_v15  ;;  %v2488_v35 = vpack.c.bf16 %v2480_v41, %v3033_v6 }
 0x262   :  { %3373 = vmatprep.mubr.bf16.mxu1 %v3041_v45 }
 0x268   :  { %2819 = vmatmul.mubr.bf16.gmra.mrb[132].mxu0 %v2454_v27 }
 0x269   :  { %3374 = vmatmul.mubr.bf16.gmra.mrb[84].mxu1 %v6198_v57  ;;  %2826 = vmatprep.mubr.bf16.mxu0 %v2487_v36  ;;  %v3067_v57 = vld [vmem:[#allocation2 + $0x1d1] sm:$0xff] }
 0x26a   :  { %3381 = vmatprep.mubr.bf16.mxu1 %v3042_v16  ;;  %v3075_v20 = vpack.c.bf16 %v3067_v57, %v6222_v24 }
 0x270   :  { %2827 = vmatmul.mubr.bf16.gmra.mrb[136].mxu0 %v2455_v40 }
 0x271   :  { %3382 = vmatmul.mubr.bf16.gmra.mrb[88].mxu1 %v6226_v60  ;;  %2834 = vmatprep.mubr.bf16.mxu0 %v2488_v35 }
 0x272   :  { %3389 = vmatprep.mubr.bf16.mxu1 %v3043_v61 }
 0x278   :  { %2835 = vmatmul.mubr.bf16.gmra.mrb[140].mxu0 %v2456_v1 }
 0x279   :  { %3390 = vmatmul.mubr.bf16.gmra.mrb[92].mxu1 %v3011_v42 }
 0x27a   :  { %4730 = vmatprep.mubr.bf16.mxu1 %v5993_v3 }
 0x281   :  { %4731 = vmatmul.mubr.bf16.vlgmr.msra.gmra.mrb[48].mxu1 %v6003_v17 }
 0x282   :  { %4734 = vmatprep.mubr.bf16.mxu1 %v6037_v48 }
 0x289   :  { %4735 = vmatmul.mubr.bf16.gmra.mrb[52].mxu1 %v3071_v7 }
 0x28a   :  { %4738 = vmatprep.mubr.bf16.mxu1 %v6079_v62 }
 0x291   :  { %4739 = vmatmul.mubr.bf16.gmra.mrb[56].mxu1 %v6090_v49 }
 0x292   :  { %4742 = vmatprep.mubr.bf16.mxu1 %v6121_v11 }
 0x299   :  { %4743 = vmatmul.mubr.bf16.gmra.mrb[60].mxu1 %v3075_v20 }
 0x2d3   :  { %v4330_v44 = vpop.f32.mrb[80].mxu0 }
 0x2d4   :  { %v4331_v3 = vpop.f32.mrb[81].mxu0 }
 0x2d5   :  { %v4332_v29 = vadd.f32 %v4331_v3, %v4330_v44  ;;  %v4333_v17 = vpop.f32.mrb[82].mxu0 }
 0x2d6   :  { %v4334_v25 = vpop.f32.mrb[83].mxu0 }
 0x2d7   :  { %v4335_v48 = vadd.f32 %v4334_v25, %v4333_v17 }
 0x2db   :  { %v4336_v60 = vpop.f32.mrb[84].mxu0 }
 0x2dc   :  { %v4337_v32 = vpop.f32.mrb[85].mxu0 }
 0x2dd   :  { %v6317_v10 = vadd.f32 %v4337_v32, %v4336_v60  ;;  %v4339_v53 = vpop.f32.mrb[86].mxu0 }
 0x2de   :  { %v4340_v62 = vpop.f32.mrb[87].mxu0 }
 0x2df   :  { %v6319_v54 = vadd.f32 %v4340_v62, %v4339_v53 }
 0x2e3   :  { %v4342_v49 = vpop.f32.mrb[88].mxu0 }
 0x2e4   :  { %v4343_v11 = vpop.f32.mrb[89].mxu0 }
 0x2e5   :  { %v6321_v0 = vadd.f32 %v4343_v11, %v4342_v49  ;;  %v4345_v24 = vpop.f32.mrb[90].mxu0 }
 0x2e6   :  { %v4346_v31 = vpop.f32.mrb[91].mxu0 }
 0x2e7   :  { %v6323_v59 = vadd.f32 %v4346_v31, %v4345_v24 }
 0x2eb   :  { %v4348_v26 = vpop.f32.mrb[92].mxu0 }
 0x2ec   :  { %v4349_v63 = vpop.f32.mrb[93].mxu0 }
 0x2ed   :  { %v6325_v23 = vadd.f32 %v4349_v63, %v4348_v26  ;;  %v4351_v18 = vpop.f32.mrb[94].mxu0 }
 0x2ee   :  { %v4352_v8 = vpop.f32.mrb[95].mxu0 }
 0x2ef   :  { %v6327_v9 = vadd.f32 %v4352_v8, %v4351_v18 }
 0x2f3   :  { %v4354_v55 = vpop.f32.mrb[96].mxu0 }
 0x2f4   :  { %v4355_v51 = vpop.f32.mrb[97].mxu0 }
 0x2f5   :  { %v6329_v2 = vadd.f32 %v4355_v51, %v4354_v55  ;;  %v4357_v50 = vpop.f32.mrb[98].mxu0 }
 0x2f6   :  { %v4358_v56 = vpop.f32.mrb[99].mxu0 }
 0x2f7   :  { %v6331_v30 = vadd.f32 %v4358_v56, %v4357_v50 }
 0x2fb   :  { %v4360_v21 = vpop.f32.mrb[100].mxu0 }
 0x2fc   :  { %v4361_v5 = vpop.f32.mrb[101].mxu0 }
 0x2fd   :  { %v6333_v28 = vadd.f32 %v4361_v5, %v4360_v21  ;;  %v4363_v47 = vpop.f32.mrb[102].mxu0 }
 0x2fe   :  { %v4364_v22 = vpop.f32.mrb[103].mxu0 }
 0x2ff   :  { %v6335_v46 = vadd.f32 %v4364_v22, %v4363_v47 }
 0x303   :  { %v4366_v58 = vpop.f32.mrb[104].mxu0 }
 0x304   :  { %v4367_v52 = vpop.f32.mrb[105].mxu0 }
 0x305   :  { %v6337_v37 = vadd.f32 %v4367_v52, %v4366_v58  ;;  %v4369_v4 = vpop.f32.mrb[106].mxu0 }
 0x306   :  { %v4370_v45 = vpop.f32.mrb[107].mxu0 }
 0x307   :  { %v6339_v15 = vadd.f32 %v4370_v45, %v4369_v4 }
 0x30b   :  { %v4372_v12 = vpop.f32.mrb[108].mxu0 }
 0x30c   :  { %v4373_v6 = vpop.f32.mrb[109].mxu0 }
 0x30d   :  { %v6341_v27 = vadd.f32 %v4373_v6, %v4372_v12  ;;  %v4375_v36 = vpop.f32.mrb[110].mxu0 }
 0x30e   :  { %v4376_v16 = vpop.f32.mrb[111].mxu0 }
 0x30f   :  { %v6343_v41 = vadd.f32 %v4376_v16, %v4375_v36 }
 0x313   :  { %v4410_v40 = vpop.f32.mrb[112].mxu0 }
 0x314   :  { %v4490_v35 = vpop.f32.mrb[64].mxu1  ;;  %v4411_v61 = vpop.f32.mrb[113].mxu0 }
 0x315   :  { %v4412_v13 = vadd.f32 %v4411_v61, %v4410_v40  ;;  %v4491_v14 = vpop.f32.mrb[65].mxu1  ;;  %v4413_v1 = vpop.f32.mrb[114].mxu0 }
 0x316   :  { %v4492_v42 = vadd.f32 %v4491_v14, %v4490_v35  ;;  %v4493_v43 = vpop.f32.mrb[66].mxu1  ;;  %v4414_v7 = vpop.f32.mrb[115].mxu0 }
 0x317   :  { %v4813_v57 = vadd.f32 %v4412_v13, %v4332_v29  ;;  %v4415_v20 = vadd.f32 %v4414_v7, %v4413_v1  ;;  %v4494_v44 = vpop.f32.mrb[67].mxu1 }
 0x318   :  { %v4495_v3 = vadd.f32 %v4494_v44, %v4493_v43 }
 0x319   :  { %v4819_v17 = vadd.f32 %v4415_v20, %v4335_v48  ;;  %v6345_v25 = vadd.f32 %v4813_v57, %v4492_v42 }
 0x31b   :  { %v4416_v60 = vpop.f32.mrb[116].mxu0  ;;  %v6347_v32 = vadd.f32 %v4819_v17, %v4495_v3 }
 0x31c   :  { %v4496_v53 = vpop.f32.mrb[68].mxu1  ;;  %v4417_v62 = vpop.f32.mrb[117].mxu0 }
 0x31d   :  { %v4418_v49 = vadd.f32 %v4417_v62, %v4416_v60  ;;  %v4497_v11 = vpop.f32.mrb[69].mxu1  ;;  %v4419_v24 = vpop.f32.mrb[118].mxu0 }
 0x31e   :  { %v4498_v31 = vadd.f32 %v4497_v11, %v4496_v53  ;;  %v4499_v26 = vpop.f32.mrb[70].mxu1  ;;  %v4420_v63 = vpop.f32.mrb[119].mxu0 }
 0x31f   :  { %v4810_v18 = vadd.f32 %v4418_v49, %v6317_v10  ;;  %v4421_v29 = vadd.f32 %v4420_v63, %v4419_v24  ;;  %v4500_v8 = vpop.f32.mrb[71].mxu1 }
 0x320   :  { %v4501_v55 = vadd.f32 %v4500_v8, %v4499_v26 }
 0x321   :  { %v4816_v48 = vadd.f32 %v4421_v29, %v6319_v54  ;;  %v6351_v51 = vadd.f32 %v4810_v18, %v4498_v31 }
 0x323   :  { %v4422_v50 = vpop.f32.mrb[120].mxu0  ;;  %v6353_v56 = vadd.f32 %v4816_v48, %v4501_v55 }
 0x324   :  { %v4502_v21 = vpop.f32.mrb[72].mxu1  ;;  %v4423_v5 = vpop.f32.mrb[121].mxu0 }
 0x325   :  { %v4424_v47 = vadd.f32 %v4423_v5, %v4422_v50  ;;  %v4503_v22 = vpop.f32.mrb[73].mxu1  ;;  %v4425_v58 = vpop.f32.mrb[122].mxu0 }
 0x326   :  { %v4504_v52 = vadd.f32 %v4503_v22, %v4502_v21  ;;  %v4505_v4 = vpop.f32.mrb[74].mxu1  ;;  %v4426_v45 = vpop.f32.mrb[123].mxu0 }
 0x327   :  { %v4825_v10 = vadd.f32 %v4424_v47, %v6321_v0  ;;  %v4427_v12 = vadd.f32 %v4426_v45, %v4425_v58  ;;  %v4506_v6 = vpop.f32.mrb[75].mxu1 }
 0x328   :  { %v4507_v36 = vadd.f32 %v4506_v6, %v4505_v4 }
 0x329   :  { %v4831_v54 = vadd.f32 %v4427_v12, %v6323_v59  ;;  %v6357_v16 = vadd.f32 %v4825_v10, %v4504_v52 }
 0x32b   :  { %v4428_v40 = vpop.f32.mrb[124].mxu0  ;;  %v6359_v35 = vadd.f32 %v4831_v54, %v4507_v36 }
 0x32c   :  { %v4508_v61 = vpop.f32.mrb[76].mxu1  ;;  %v4429_v13 = vpop.f32.mrb[125].mxu0 }
 0x32d   :  { %v4430_v14 = vadd.f32 %v4429_v13, %v4428_v40  ;;  %v4509_v1 = vpop.f32.mrb[77].mxu1  ;;  %v4431_v42 = vpop.f32.mrb[126].mxu0 }
 0x32e   :  { %v4510_v43 = vadd.f32 %v4509_v1, %v4508_v61  ;;  %v4511_v7 = vpop.f32.mrb[78].mxu1  ;;  %v4432_v57 = vpop.f32.mrb[127].mxu0 }
 0x32f   :  { %v4822_v0 = vadd.f32 %v4430_v14, %v6325_v23  ;;  %v4433_v20 = vadd.f32 %v4432_v57, %v4431_v42  ;;  %v4512_v44 = vpop.f32.mrb[79].mxu1 }
 0x330   :  { %v4513_v3 = vadd.f32 %v4512_v44, %v4511_v7 }
 0x331   :  { %v4828_v59 = vadd.f32 %v4433_v20, %v6327_v9  ;;  %v6363_v17 = vadd.f32 %v4822_v0, %v4510_v43 }
 0x333   :  { %v4434_v60 = vpop.f32.mrb[128].mxu0  ;;  %v6365_v53 = vadd.f32 %v4828_v59, %v4513_v3 }
 0x334   :  { %v4514_v62 = vpop.f32.mrb[80].mxu1  ;;  %v4435_v49 = vpop.f32.mrb[129].mxu0 }
 0x335   :  { %v4436_v11 = vadd.f32 %v4435_v49, %v4434_v60  ;;  %v4515_v24 = vpop.f32.mrb[81].mxu1  ;;  %v4437_v31 = vpop.f32.mrb[130].mxu0 }
 0x336   :  { %v4516_v26 = vadd.f32 %v4515_v24, %v4514_v62  ;;  %v4517_v63 = vpop.f32.mrb[82].mxu1  ;;  %v4438_v18 = vpop.f32.mrb[131].mxu0 }
 0x337   :  { %v4837_v23 = vadd.f32 %v4436_v11, %v6329_v2  ;;  %v4439_v29 = vadd.f32 %v4438_v18, %v4437_v31  ;;  %v4518_v8 = vpop.f32.mrb[83].mxu1 }
 0x338   :  { %v4519_v55 = vadd.f32 %v4518_v8, %v4517_v63 }
 0x339   :  { %v4843_v9 = vadd.f32 %v4439_v29, %v6331_v30  ;;  %v6369_v48 = vadd.f32 %v4837_v23, %v4516_v26 }
 0x33b   :  { %v4440_v50 = vpop.f32.mrb[132].mxu0  ;;  %v6371_v21 = vadd.f32 %v4843_v9, %v4519_v55 }
 0x33c   :  { %v4520_v5 = vpop.f32.mrb[84].mxu1  ;;  %v4441_v47 = vpop.f32.mrb[133].mxu0 }
 0x33d   :  { %v4442_v22 = vadd.f32 %v4441_v47, %v4440_v50  ;;  %v4521_v58 = vpop.f32.mrb[85].mxu1  ;;  %v4443_v52 = vpop.f32.mrb[134].mxu0 }
 0x33e   :  { %v4522_v4 = vadd.f32 %v4521_v58, %v4520_v5  ;;  %v4523_v45 = vpop.f32.mrb[86].mxu1  ;;  %v4444_v10 = vpop.f32.mrb[135].mxu0 }
 0x33f   :  { %v4834_v2 = vadd.f32 %v4442_v22, %v6333_v28  ;;  %v4445_v12 = vadd.f32 %v4444_v10, %v4443_v52  ;;  %v4524_v6 = vpop.f32.mrb[87].mxu1 }
 0x340   :  { %v4525_v36 = vadd.f32 %v4524_v6, %v4523_v45 }
 0x341   :  { %v4840_v30 = vadd.f32 %v4445_v12, %v6335_v46  ;;  %v4835_v54 = vadd.f32 %v4834_v2, %v4522_v4 }
 0x343   :  { %v4446_v40 = vpop.f32.mrb[136].mxu0  ;;  %v4841_v61 = vadd.f32 %v4840_v30, %v4525_v36 }
 0x344   :  { %v4526_v13 = vpop.f32.mrb[88].mxu1  ;;  %v4447_v14 = vpop.f32.mrb[137].mxu0 }
 0x345   :  { %v4448_v1 = vadd.f32 %v4447_v14, %v4446_v40  ;;  %v4527_v42 = vpop.f32.mrb[89].mxu1  ;;  %v4449_v43 = vpop.f32.mrb[138].mxu0 }
 0x346   :  { %v4528_v7 = vadd.f32 %v4527_v42, %v4526_v13  ;;  %v4529_v57 = vpop.f32.mrb[90].mxu1  ;;  %v4450_v0 = vpop.f32.mrb[139].mxu0 }
 0x347   :  { %v4849_v20 = vadd.f32 %v4448_v1, %v6337_v37  ;;  %v4451_v44 = vadd.f32 %v4450_v0, %v4449_v43  ;;  %v4530_v28 = vpop.f32.mrb[91].mxu1 }
 0x348   :  { %v4531_v3 = vadd.f32 %v4530_v28, %v4529_v57 }
 0x349   :  { %v4855_v59 = vadd.f32 %v4451_v44, %v6339_v15  ;;  %v4850_v60 = vadd.f32 %v4849_v20, %v4528_v7 }
 0x34b   :  { %v4452_v46 = vpop.f32.mrb[140].mxu0  ;;  %v4856_v62 = vadd.f32 %v4855_v59, %v4531_v3 }
 0x34c   :  { %v4532_v49 = vpop.f32.mrb[92].mxu1  ;;  %v4453_v11 = vpop.f32.mrb[141].mxu0 }
 0x34d   :  { %v4454_v24 = vadd.f32 %v4453_v11, %v4452_v46  ;;  %v4533_v31 = vpop.f32.mrb[93].mxu1  ;;  %v4455_v26 = vpop.f32.mrb[142].mxu0 }
 0x34e   :  { %v4534_v63 = vadd.f32 %v4533_v31, %v4532_v49  ;;  %v4535_v18 = vpop.f32.mrb[94].mxu1  ;;  %v4456_v23 = vpop.f32.mrb[143].mxu0 }
 0x34f   :  { %v4846_v29 = vadd.f32 %v4454_v24, %v6341_v27  ;;  %v4457_v8 = vadd.f32 %v4456_v23, %v4455_v26  ;;  %v4536_v37 = vpop.f32.mrb[95].mxu1 }
 0x350   :  { %v4537_v55 = vadd.f32 %v4536_v37, %v4535_v18 }
 0x351   :  { %v4852_v9 = vadd.f32 %v4457_v8, %v6343_v41  ;;  %v4847_v50 = vadd.f32 %v4846_v29, %v4534_v63 }
 0x353   :  { %v4853_v15 = vadd.f32 %v4852_v9, %v4537_v55 }
 0x354   :  { %v4732_v5 = vpop.f32.mrb[48].mxu1 }
 0x355   :  { %v4812_v47 = vadd.f32 %v6351_v51, %v4732_v5  ;;  %v3432_v22 = vpop.f32.mrb[49].mxu1 }
 0x356   :  { %v4815_v58 = vadd.f32 %v6345_v25, %v3432_v22  ;;  %v4733_v52 = vpop.f32.mrb[50].mxu1 }
 0x357   :  { %v4818_v4 = vadd.f32 %v6353_v56, %v4733_v52  ;;  %v3435_v45 = vpop.f32.mrb[51].mxu1 }
 0x358   :  { %v4821_v10 = vadd.f32 %v6347_v32, %v3435_v45 }
 0x35a   :  { %v3559_v27 = vadd.f32 %v4821_v10, %v4815_v58 }
 0x35c   :  { %v3560_v2 = vadd.f32 %v4812_v47, %v3559_v27  ;;  %v4736_v12 = vpop.f32.mrb[52].mxu1 }
 0x35d   :  { %v4824_v6 = vadd.f32 %v6363_v17, %v4736_v12  ;;  %v3448_v41 = vpop.f32.mrb[53].mxu1 }
 0x35e   :  { %v4827_v36 = vadd.f32 %v6357_v16, %v3448_v41  ;;  %v3561_v30 = vadd.f32 %v4818_v4, %v3560_v2  ;;  %v4737_v40 = vpop.f32.mrb[54].mxu1 }
 0x35f   :  { %v4830_v51 = vadd.f32 %v6365_v53, %v4737_v40  ;;  %v3451_v13 = vpop.f32.mrb[55].mxu1 }
 0x360   :  { %v3562_v25 = vadd.f32 %v4827_v36, %v3561_v30  ;;  %v4833_v14 = vadd.f32 %v6359_v35, %v3451_v13 }
 0x362   :  { %v3563_v56 = vadd.f32 %v4833_v14, %v3562_v25 }
 0x364   :  { %v3564_v1 = vadd.f32 %v4824_v6, %v3563_v56  ;;  %v4740_v42 = vpop.f32.mrb[56].mxu1 }
 0x365   :  { %v4836_v32 = vadd.f32 %v4835_v54, %v4740_v42  ;;  %v3464_v43 = vpop.f32.mrb[57].mxu1 }
 0x366   :  { %v4839_v7 = vadd.f32 %v6369_v48, %v3464_v43  ;;  %v3565_v57 = vadd.f32 %v4830_v51, %v3564_v1  ;;  %v4741_v17 = vpop.f32.mrb[58].mxu1 }
 0x367   :  { %v4842_v0 = vadd.f32 %v4841_v61, %v4741_v17  ;;  %v3467_v20 = vpop.f32.mrb[59].mxu1 }
 0x368   :  { %v3566_v16 = vadd.f32 %v4839_v7, %v3565_v57  ;;  %v4845_v44 = vadd.f32 %v6371_v21, %v3467_v20 }
 0x36a   :  { %v3567_v28 = vadd.f32 %v4845_v44, %v3566_v16 }
 0x36c   :  { %v3568_v53 = vadd.f32 %v4836_v32, %v3567_v28  ;;  %v4744_v3 = vpop.f32.mrb[60].mxu1 }
 0x36d   :  { %v4848_v59 = vadd.f32 %v4847_v50, %v4744_v3  ;;  %v3480_v46 = vpop.f32.mrb[61].mxu1 }
 0x36e   :  { %v4851_v35 = vadd.f32 %v4850_v60, %v3480_v46  ;;  %v3569_v49 = vadd.f32 %v4842_v0, %v3568_v53  ;;  %v4745_v11 = vpop.f32.mrb[62].mxu1 }
 0x36f   :  { %v4854_v24 = vadd.f32 %v4853_v15, %v4745_v11  ;;  %v3483_v54 = vpop.f32.mrb[63].mxu1 }
 0x370   :  { %v3570_v31 = vadd.f32 %v4851_v35, %v3569_v49  ;;  %v4857_v26 = vadd.f32 %v4856_v62, %v3483_v54 }
 0x372   :  { %v3571_v48 = vadd.f32 %v4857_v26, %v3570_v31 }
 0x374   :  { %v3572_v63 = vadd.f32 %v4848_v59, %v3571_v48 }
 0x376   :  { %v3573_v18 = vadd.f32 %v4854_v24, %v3572_v63 }
 0x378   :  { %v3574_v61 = vrot.slane %v3573_v18, 4 }
 0x37a   :  { %v3575_v23 = vadd.f32 %v3574_v61, %v3573_v18 }
 0x37c   :  { %v3576_v29 = vrot.slane %v3575_v23, 2 }
 0x37e   :  { %v3577_v8 = vadd.f32 %v3576_v29, %v3575_v23 }
 0x380   :  { %v3578_v21 = vrot.slane %v3577_v8, 1 }
 0x382   :  { %v3579_v37 = vadd.f32 %v3578_v21, %v3577_v8  ;;  %v3635_v8 = vld [vmem:[%s6506_s5] sm:$0x1] }
 0x384   :  { %v3580_v55 = vmul.f32 0.0078125, %v3579_v37 }
 0x386   :  { %v3581_v9 = vsub.f32 %v4815_v58, %v3580_v55  ;;  %v3582_v50 = vsub.f32 %v4821_v10, %v3580_v55  ;;  %v3583_v5 = vsub.f32 %v4812_v47, %v3580_v55  ;;  %v3584_v60 = vsub.f32 %v4818_v4, %v3580_v55 }
 0x387   :  { %v3585_v22 = vsub.f32 %v4827_v36, %v3580_v55  ;;  %v3586_v52 = vsub.f32 %v4833_v14, %v3580_v55  ;;  %v3587_v15 = vsub.f32 %v4824_v6, %v3580_v55  ;;  %v3588_v45 = vsub.f32 %v4830_v51, %v3580_v55 }
 0x388   :  { %v6389_v27 = vsub.f32 %v4839_v7, %v3580_v55  ;;  %v6391_v62 = vsub.f32 %v4845_v44, %v3580_v55  ;;  %v6393_v2 = vsub.f32 %v4836_v32, %v3580_v55  ;;  %v6395_v12 = vsub.f32 %v4842_v0, %v3580_v55 }
 0x389   :  { %v6397_v41 = vsub.f32 %v4851_v35, %v3580_v55  ;;  %v6399_v30 = vsub.f32 %v4857_v26, %v3580_v55  ;;  %v6401_v58 = vsub.f32 %v4848_v59, %v3580_v55  ;;  %v6403_v47 = vsub.f32 %v4854_v24, %v3580_v55 }
 0x38a   :  { %v3597_v4 = vmul.f32 %v3581_v9, %v3581_v9  ;;  %v3598_v10 = vmul.f32 %v3582_v50, %v3582_v50  ;;  %v3599_v6 = vmul.f32 %v3583_v5, %v3583_v5  ;;  %v3600_v40 = vmul.f32 %v3584_v60, %v3584_v60 }
 0x38b   :  { %v3601_v13 = vmul.f32 %v3585_v22, %v3585_v22  ;;  %v3602_v14 = vmul.f32 %v3586_v52, %v3586_v52  ;;  %v3603_v1 = vmul.f32 %v3587_v15, %v3587_v15  ;;  %v3604_v32 = vmul.f32 %v3588_v45, %v3588_v45 }
 0x38c   :  { %v3613_v36 = vadd.f32 %v3598_v10, %v3597_v4  ;;  %v3605_v7 = vmul.f32 %v6389_v27, %v6389_v27  ;;  %v3606_v17 = vmul.f32 %v6391_v62, %v6391_v62  ;;  %v3607_v20 = vmul.f32 %v6393_v2, %v6393_v2 }
 0x38d   :  { %v3608_v44 = vmul.f32 %v6395_v12, %v6395_v12  ;;  %v3609_v53 = vmul.f32 %v6397_v41, %v6397_v41  ;;  %v3610_v59 = vmul.f32 %v6399_v30, %v6399_v30  ;;  %v3611_v35 = vmul.f32 %v6401_v58, %v6401_v58 }
 0x38e   :  { %v3614_v51 = vadd.f32 %v3613_v36, %v3599_v6  ;;  %v3612_v11 = vmul.f32 %v6403_v47, %v6403_v47  ;;  %v6540_v55 = vsub.s32 0, %v5877_v19 }
 0x390   :  { %v3615_v25 = vadd.f32 %v3614_v51, %v3600_v40 }
 0x392   :  { %v3616_v56 = vadd.f32 %v3615_v25, %v3601_v13 }
 0x394   :  { %v3617_v42 = vadd.f32 %v3616_v56, %v3602_v14  ;;  %v4073_v56 = vld [vmem:[%s6507_s6] ss:$0 sm:$0xff] }
 0x396   :  { %v3618_v43 = vadd.f32 %v3617_v42, %v3603_v1 }
 0x398   :  { %v3619_v57 = vadd.f32 %v3618_v43, %v3604_v32 }
 0x39a   :  { %v3620_v0 = vadd.f32 %v3619_v57, %v3605_v7 }
 0x39c   :  { %v3621_v16 = vadd.f32 %v3620_v0, %v3606_v17 }
 0x39e   :  { %v3622_v28 = vadd.f32 %v3621_v16, %v3607_v20 }
 0x3a0   :  { %v3623_v3 = vadd.f32 %v3622_v28, %v3608_v44  ;;  %v6541_v28 = vld [vmem:[#allocation5_spill] sm:$0xff] }
 0x3a2   :  { %v3624_v46 = vadd.f32 %v3623_v3, %v3609_v53  ;;  %v6542_v3 = vld [vmem:[#allocation6_spill] sm:$0xff] }
 0x3a4   :  { %v3625_v49 = vadd.f32 %v3624_v46, %v3610_v59  ;;  %v6543_v46 = vld [vmem:[#allocation7_spill] sm:$0xff] }
 0x3a6   :  { %v3626_v24 = vadd.f32 %v3625_v49, %v3611_v35  ;;  %v6544_v49 = vld [vmem:[#allocation8_spill] sm:$0xff] }
 0x3a8   :  { %v3627_v54 = vadd.f32 %v3626_v24, %v3612_v11  ;;  %v6545_v24 = vld [vmem:[#allocation9_spill] sm:$0xff] }
 0x3aa   :  { %v3628_v31 = vrot.slane %v3627_v54, 4 }
 0x3ac   :  { %v3629_v26 = vadd.f32 %v3628_v31, %v3627_v54  ;;  %v6546_v31 = vld [vmem:[#allocation10_spill] sm:$0xff] }
 0x3ae   :  { %v3630_v48 = vrot.slane %v3629_v26, 2 }
 0x3b0   :  { %v3631_v63 = vadd.f32 %v3630_v48, %v3629_v26  ;;  %v6547_v48 = vld [vmem:[#allocation11_spill] sm:$0xff] }
 0x3b2   :  { %v3632_v18 = vrot.slane %v3631_v63, 1 }
 0x3b4   :  { %v3633_v61 = vadd.f32 %v3632_v18, %v3631_v63  ;;  %v6548_v63 = vld [vmem:[#allocation12_spill] sm:$0xff]  ;;  %v6549_v18 = vld [vmem:[#allocation13_spill] sm:$0xff] }
 0x3b6   :  { %v3634_v23 = vmul.f32 0.0078125, %v3633_v61  ;;  %v6550_v61 = vld [vmem:[#allocation14_spill] sm:$0xff] }
 0x3b8   :  { %v3636_v29 = vadd.f32 1e-05, %v3634_v23  ;;  %v6551_v23 = vld [vmem:[#allocation15_spill] sm:$0xff] }
 0x3ba   :  { %5053 = vrsqrt.f32 %v3636_v29 }
 0x3c4   :  { %v5054_v21 = vpop.eup %5053 }
 0x3c5   :  { %v3638_v37 = vmul.f32 %v5054_v21, %v3635_v8  ;;  %v6552_v8 = vld [vmem:[#allocation16_spill] sm:$0xff] }
 0x3c7   :  { %v3643_v4 = vrot.slane %v3638_v37, %v6540_v55 }
 0x3c9   :  { %v3645_v10 = vmul.f32 %v3643_v4, %v3581_v9  ;;  %v3646_v6 = vmul.f32 %v3643_v4, %v3582_v50  ;;  %v3647_v36 = vmul.f32 %v3643_v4, %v3583_v5  ;;  %v3648_v40 = vmul.f32 %v3643_v4, %v3584_v60 }
 0x3ca   :  { %v3649_v51 = vmul.f32 %v3643_v4, %v3585_v22  ;;  %v3650_v13 = vmul.f32 %v3643_v4, %v3586_v52  ;;  %v3651_v25 = vmul.f32 %v3643_v4, %v3587_v15  ;;  %v3652_v14 = vmul.f32 %v3643_v4, %v3588_v45 }
 0x3cb   :  { %v3653_v1 = vmul.f32 %v3643_v4, %v6389_v27  ;;  %v3654_v42 = vmul.f32 %v3643_v4, %v6391_v62  ;;  %v3655_v32 = vmul.f32 %v3643_v4, %v6393_v2  ;;  %v3656_v19 = vmul.f32 %v3643_v4, %v6395_v12 }
 0x3cc   :  { %v3657_v9 = vmul.f32 %v3643_v4, %v6397_v41  ;;  %v3658_v50 = vmul.f32 %v3643_v4, %v6399_v30  ;;  %v3659_v5 = vmul.f32 %v3643_v4, %v6401_v58  ;;  %v3660_v60 = vmul.f32 %v3643_v4, %v6403_v47 }
 0x3cd   :  { %v3668_v22 = vadd.f32 %v4073_v56, %v3645_v10  ;;  %v3669_v52 = vadd.f32 %v4073_v56, %v3646_v6  ;;  %v3670_v15 = vadd.f32 %v4073_v56, %v3647_v36  ;;  %v3671_v45 = vadd.f32 %v4073_v56, %v3648_v40 }
 0x3ce   :  { %v3672_v43 = vadd.f32 %v4073_v56, %v3649_v51  ;;  %v3673_v27 = vadd.f32 %v4073_v56, %v3650_v13  ;;  %v3674_v7 = vadd.f32 %v4073_v56, %v3651_v25  ;;  %v3675_v62 = vadd.f32 %v4073_v56, %v3652_v14 }
 0x3cf   :  { %v3676_v57 = vadd.f32 %v4073_v56, %v3653_v1  ;;  %v3677_v2 = vadd.f32 %v4073_v56, %v3654_v42  ;;  %v3678_v17 = vadd.f32 %v4073_v56, %v3655_v32  ;;  %v3679_v12 = vadd.f32 %v4073_v56, %v3656_v19 }
 0x3d0   :  { %v3680_v0 = vadd.f32 %v4073_v56, %v3657_v9  ;;  %v3681_v41 = vadd.f32 %v4073_v56, %v3658_v50  ;;  %v3682_v20 = vadd.f32 %v4073_v56, %v3659_v5  ;;  %v3683_v30 = vadd.f32 %v4073_v56, %v3660_v60 }
 0x3d1   :  { %v3684_v58 = vadd.f32 %v3668_v22, %v5241_v33  ;;  %v3685_v47 = vadd.f32 %v3669_v52, %v5246_v34  ;;  %v3686_v16 = vadd.f32 %v3670_v15, %v5260_v38  ;;  %v3687_v44 = vadd.f32 %v3671_v45, %v5265_v39 }
 0x3d2   :  { %v3688_v53 = vadd.f32 %v3672_v43, %v6541_v28  ;;  %v3689_v59 = vadd.f32 %v3673_v27, %v6542_v3  ;;  %v3690_v35 = vadd.f32 %v3674_v7, %v6543_v46  ;;  %v3691_v11 = vadd.f32 %v3675_v62, %v6544_v49 }
 0x3d3   :  { %v3692_v54 = vadd.f32 %v3676_v57, %v6545_v24  ;;  %v3693_v26 = vadd.f32 %v3677_v2, %v6546_v31  ;;  %v3694_v33 = vadd.f32 %v3678_v17, %v6547_v48  ;;  %v3695_v34 = vadd.f32 %v3679_v12, %v6548_v63 }
 0x3d4   :  { %v3696_v38 = vadd.f32 %v3680_v0, %v6549_v18  ;;  %v3697_v39 = vadd.f32 %v3681_v41, %v6550_v61  ;;  %v3698_v29 = vadd.f32 %v3682_v20, %v6551_v23  ;;  %v3699_v21 = vadd.f32 %v3683_v30, %v6552_v8 }
 0x3d5   :  { %v3700_v37 = vmax.f32 %v3684_v58, 0.0  ;;  %v3701_v55 = vmax.f32 %v3685_v47, 0.0  ;;  %v3702_v4 = vmax.f32 %v3686_v16, 0.0  ;;  %v3703_v10 = vmax.f32 %v3687_v44, 0.0 }
 0x3d6   :  { %v3704_v6 = vmax.f32 %v3688_v53, 0.0  ;;  %v3705_v36 = vmax.f32 %v3689_v59, 0.0  ;;  %v3706_v40 = vmax.f32 %v3690_v35, 0.0  ;;  %v3707_v51 = vmax.f32 %v3691_v11, 0.0 }
 0x3d7   :  { %v3708_v13 = vmax.f32 %v3692_v54, 0.0  ;;  %v3709_v25 = vmax.f32 %v3693_v26, 0.0  ;;  %v3710_v14 = vmax.f32 %v3694_v33, 0.0  ;;  %v3711_v56 = vmax.f32 %v3695_v34, 0.0  ;;  %3716 = vst [vmem:[%s6508_s7] sm:$0xff] %v3700_v37  ;;  %3717 = vst [vmem:[%s6508_s7 + $0x8] sm:$0xff] %v3701_v55 }
 0x3d8   :  { %3718 = vst [vmem:[%s6508_s7 + $0x10] sm:$0xff] %v3702_v4  ;;  %3719 = vst [vmem:[%s6508_s7 + $0x18] sm:$0xff] %v3703_v10  ;;  %v3712_v1 = vmax.f32 %v3696_v38, 0.0  ;;  %v3713_v42 = vmax.f32 %v3697_v39, 0.0  ;;  %v3714_v32 = vmax.f32 %v3698_v29, 0.0  ;;  %v3715_v19 = vmax.f32 %v3699_v21, 0.0 }
 0x3d9   :  { %3720 = vst [vmem:[%s6508_s7 + $0x20] sm:$0xff] %v3704_v6  ;;  %3721 = vst [vmem:[%s6508_s7 + $0x28] sm:$0xff] %v3705_v36 }
 0x3da   :  { %3722 = vst [vmem:[%s6508_s7 + $0x30] sm:$0xff] %v3706_v40  ;;  %3723 = vst [vmem:[%s6508_s7 + $0x38] sm:$0xff] %v3707_v51 }
 0x3db   :  { %3724 = vst [vmem:[%s6508_s7 + $0x40] sm:$0xff] %v3708_v13  ;;  %3725 = vst [vmem:[%s6508_s7 + $0x48] sm:$0xff] %v3709_v25 }
 0x3dc   :  { %3726 = vst [vmem:[%s6508_s7 + $0x50] sm:$0xff] %v3710_v14  ;;  %3727 = vst [vmem:[%s6508_s7 + $0x58] sm:$0xff] %v3711_v56 }
 0x3dd   :  { %3728 = vst [vmem:[%s6508_s7 + $0x60] sm:$0xff] %v3712_v1  ;;  %3729 = vst [vmem:[%s6508_s7 + $0x68] sm:$0xff] %v3713_v42 }
 0x3de   :  { %3730 = vst [vmem:[%s6508_s7 + $0x70] sm:$0xff] %v3714_v32  ;;  %3731 = vst [vmem:[%s6508_s7 + $0x78] sm:$0xff] %v3715_v19 }

</bundles_post_ra>
